<compile_context>
chip_gen: v7x
topology: tpu7x:2x2x1
jax: 0.10.0
libtpu: 0.0.40
codegen_flags: <defaults>
</compile_context>

<pallas_src>
import functools

import numpy as np

import jax
import jax.numpy as jnp
from jax.experimental import pallas as pl
from jax.experimental.pallas import tpu as pltpu


# ----------------------------- Pallas kernel ---------------------------------
def _fused_net_kernel(*refs, num_mid):
    """Whole network for ONE sample (one grid step).

    refs layout (inputs..., output):
      patches0 : (1, T0, K0) bf16  im2col patches of the first conv
      w0       : (K0, C)     bf16  first conv weight (BN scale folded)
      s0       : (1, C)      f32   first conv shift (bias + BN folded)
      per middle (4x4 / stride-2 / pad-1) conv layer:
        g      : (16*P, H*H) bf16  0/1 gather matrix (im2col as a matmul)
        w      : (16*C, C)   bf16  conv weight (BN scale folded)
        s      : (1, C)      f32   shift
      wlast    : (T*C, Co)   bf16  final conv weight, flattened, Co padded
      blast    : (1, Co)     f32   final conv bias (padded)
      out      : (1, 1, Co)  f32
    """
    (p0_ref, w0_ref, s0_ref), rest = refs[:3], refs[3:]
    mid_refs = rest[:3 * num_mid]
    wl_ref, bl_ref, o_ref = rest[3 * num_mid:]

    # --- first conv (+BN+LeakyReLU) on pre-extracted patches ----------------
    y = jnp.dot(p0_ref[0], w0_ref[...], preferred_element_type=jnp.float32)
    y = y + s0_ref[...]
    y = jnp.where(y > 0, y, 0.2 * y).astype(jnp.bfloat16)          # (H*H, C)

    # --- middle stride-2 convs, entirely in VMEM ----------------------------
    for m in range(num_mid):
        g_ref, w_ref, s_ref = mid_refs[3 * m:3 * m + 3]
        taps = 16                                # 4x4 kernel
        P = g_ref.shape[0] // taps               # output positions
        # im2col as one gather matmul: row (t*P + p) of `big` is the input
        # pixel feeding tap t of output position p (all-zero rows encode the
        # conv padding).  Exact: each row of g has a single 1 (or none).
        big = jnp.dot(g_ref[...], y,
                      preferred_element_type=jnp.float32).astype(jnp.bfloat16)
        patches = jnp.concatenate(
            [big[t * P:(t + 1) * P, :] for t in range(taps)], axis=1)  # (P,16C)
        y = jnp.dot(patches, w_ref[...], preferred_element_type=jnp.float32)
        y = y + s_ref[...]
        y = jnp.where(y > 0, y, 0.2 * y).astype(jnp.bfloat16)           # (P, C)

    # --- final conv: one flattened K = T*C matmul ----------------------------
    T = y.shape[0]
    row = jnp.concatenate([y[p:p + 1, :] for p in range(T)], axis=1)    # (1,T*C)
    out = jnp.dot(row, wl_ref[...], preferred_element_type=jnp.float32)
    o_ref[0] = (out + bl_ref[...]).astype(o_ref.dtype)


def fused_forward(patches0, w0, s0, mids, wlast, blast, co_pad):
    """Single pallas_call running the whole network; grid = (N,) "parallel"."""
    N, T0, K0 = patches0.shape
    C = w0.shape[1]
    num_mid = len(mids)

    in_specs = [
        pl.BlockSpec((1, T0, K0), lambda n: (n, 0, 0)),
        pl.BlockSpec(w0.shape, lambda n: (0, 0)),
        pl.BlockSpec(s0.shape, lambda n: (0, 0)),
    ]
    args = [patches0, w0, s0]
    flops = 2 * T0 * K0 * C
    for (g, w, s) in mids:
        in_specs += [pl.BlockSpec(g.shape, lambda n: (0, 0)),
                     pl.BlockSpec(w.shape, lambda n: (0, 0)),
                     pl.BlockSpec(s.shape, lambda n: (0, 0))]
        args += [g, w, s]
        flops += 2 * g.shape[0] * g.shape[1] * C
        flops += 2 * (g.shape[0] // 16) * w.shape[0] * w.shape[1]
    in_specs += [pl.BlockSpec(wlast.shape, lambda n: (0, 0)),
                 pl.BlockSpec(blast.shape, lambda n: (0, 0))]
    args += [wlast, blast]
    flops += 2 * wlast.shape[0] * wlast.shape[1]
    flops *= N

    bytes_accessed = int(sum(int(np.prod(a.shape)) * a.dtype.itemsize
                             for a in args)) + N * co_pad * 4

    kern = functools.partial(_fused_net_kernel, num_mid=num_mid)
    out = pl.pallas_call(
        kern,
        out_shape=jax.ShapeDtypeStruct((N, 1, co_pad), jnp.float32),
        grid=(N,),
        in_specs=in_specs,
        out_specs=pl.BlockSpec((1, 1, co_pad), lambda n: (n, 0, 0)),
        compiler_params=pltpu.CompilerParams(
            dimension_semantics=("parallel",),
            vmem_limit_bytes=32 * 1024 * 1024),
        cost_estimate=pl.CostEstimate(flops=int(flops), transcendentals=0,
                                      bytes_accessed=bytes_accessed),
    )(*args)
    return out.reshape(N, co_pad)


# ------------------------------ JAX glue -------------------------------------
def cat_coord(m):
    """Identical semantics to the PyTorch cat_coord (NCHW)."""
    n, _, Ny, Nx = m.shape
    xs = jnp.linspace(-1 + 1 / (2 * Nx), 1 - 1 / (2 * Nx), Nx, dtype=m.dtype)
    ys = jnp.linspace(-1 + 1 / (2 * Ny), 1 - 1 / (2 * Ny), Ny, dtype=m.dtype)
    x = jnp.broadcast_to(xs.reshape(1, 1, 1, Nx), (n, 1, Ny, Nx))
    y = jnp.broadcast_to(ys.reshape(1, 1, Ny, 1), (n, 1, Ny, Nx))
    return jnp.concatenate([m, x, y], axis=1)


def extract_patches_nhwc(x, k, stride, pad):
    """x: (N, H, W, C) -> (N, Ho, Wo, k*k*C), feature order (kh, kw, c)."""
    if pad:
        x = jnp.pad(x, ((0, 0), (pad, pad), (pad, pad), (0, 0)))
    N, Hp, Wp, C = x.shape
    Ho = (Hp - k) // stride + 1
    Wo = (Wp - k) // stride + 1
    taps = []
    for i in range(k):
        for j in range(k):
            taps.append(x[:, i:i + stride * Ho:stride, j:j + stride * Wo:stride, :])
    return jnp.concatenate(taps, axis=-1), Ho, Wo


def build_gather_matrix(H, k, s, p):
    """0/1 matrix G with G[(i*k+j)*P + (oh*Ho+ow), ar*H+ac] = 1 where
    (ar, ac) = (s*oh+i-p, s*ow+j-p) is the input pixel feeding tap (i,j) of
    output (oh, ow); out-of-range pixels (conv padding) give all-zero rows."""
    Ho = (H + 2 * p - k) // s + 1
    P = Ho * Ho
    G = np.zeros((k * k * P, H * H), np.float32)
    for i in range(k):
        for j in range(k):
            t = i * k + j
            for oh in range(Ho):
                for ow in range(Ho):
                    ar = s * oh + i - p
                    ac = s * ow + j - p
                    if 0 <= ar < H and 0 <= ac < H:
                        G[t * P + oh * Ho + ow, ar * H + ac] = 1.0
    return G


def build_layer_specs(input_channels, input_size, output_size, use_coord_conv):
    """Mirror R.__init__: per-layer (Cin, Cout, k, stride, pad, has_bn)."""
    channels = [128, 128, 128, 128, 128, 128, 128]
    cin = input_channels + (2 if use_coord_conv else 0)
    specs = [(cin, channels[0], 4, 2, 1, True)]
    block_id = 1
    size = input_size // 2
    while size > 4:
        specs.append((channels[block_id - 1], channels[block_id], 4, 2, 1, True))
        block_id += 1
        size //= 2
    specs.append((channels[block_id], output_size, size, 1, 0, False))
    return tuple(specs)


def init_params(key, specs):
    params = []
    for (cin, cout, k, _s, _p, has_bn) in specs:
        key, kw, kb, kg, kbe, km, kv = jax.random.split(key, 7)
        p = {
            "w": 0.05 * jax.random.normal(kw, (cout, cin, k, k), jnp.float32),
            "b": 0.05 * jax.random.normal(kb, (cout,), jnp.float32),
        }
        if has_bn:
            p["gamma"] = 1.0 + 0.1 * jax.random.normal(kg, (cout,), jnp.float32)
            p["beta"] = 0.05 * jax.random.normal(kbe, (cout,), jnp.float32)
            p["mean"] = 0.05 * jax.random.normal(km, (cout,), jnp.float32)
            p["var"] = 1.0 + 0.5 * jax.random.uniform(kv, (cout,), jnp.float32)
        params.append(p)
    return params


def _fold_bn(p, has_bn, eps):
    if has_bn:
        scale = p["gamma"] / jnp.sqrt(p["var"] + eps)
        shift = p["beta"] + scale * (p["b"] - p["mean"])
    else:
        scale = jnp.ones_like(p["b"])
        shift = p["b"]
    return scale, shift


def _conv_weight_matrix(w, scale):
    """(Cout, Cin, kh, kw) -> (kh*kw*Cin, Cout) bf16 with BN scale folded in."""
    cout, cin, kh, kw = w.shape
    wm = jnp.transpose(w, (2, 3, 1, 0)).reshape(kh * kw * cin, cout)
    return (wm * scale[None, :]).astype(jnp.bfloat16)


@functools.partial(jax.jit, static_argnums=(1, 3))
def forward_pallas(params, specs, x_nchw, use_coord_conv=True, eps=1e-5):
    if use_coord_conv:
        x_nchw = cat_coord(x_nchw)
    x = jnp.transpose(x_nchw, (0, 2, 3, 1)).astype(jnp.bfloat16)   # NHWC, bf16
    N = x.shape[0]

    # First conv: im2col in (jit-fused) XLA glue — it only touches the tiny
    # kernel input; everything downstream stays inside the single kernel.
    cin0, c0, k0, st0, pd0, bn0 = specs[0]
    patches, Ho, Wo = extract_patches_nhwc(x, k0, st0, pd0)
    patches0 = patches.reshape(N, Ho * Wo, k0 * k0 * cin0)
    sc0, sh0 = _fold_bn(params[0], bn0, eps)
    w0 = _conv_weight_matrix(params[0]["w"], sc0)                  # (K0, C)
    s0 = sh0.reshape(1, -1)

    # Middle stride-2 conv layers: gather matrix + folded weight per layer.
    mids = []
    H = Ho
    for p, (cin, cout, k, st, pd, has_bn) in zip(params[1:-1], specs[1:-1]):
        g = jnp.asarray(build_gather_matrix(H, k, st, pd), jnp.bfloat16)
        sc, sh = _fold_bn(p, has_bn, eps)
        mids.append((g, _conv_weight_matrix(p["w"], sc), sh.reshape(1, -1)))
        H = (H + 2 * pd - k) // st + 1

    # Final conv (kernel == full spatial extent): flattened weight, Cout
    # padded to a lane-dense multiple of 128.
    cinL, coutL, kL, stL, pdL, bnL = specs[-1]
    assert kL == H and stL == 1 and pdL == 0 and not bnL
    co_pad = ((coutL + 127) // 128) * 128
    wl = jnp.transpose(params[-1]["w"], (2, 3, 1, 0)).reshape(kL * kL * cinL, coutL)
    wl = jnp.pad(wl, ((0, 0), (0, co_pad - coutL))).astype(jnp.bfloat16)
    bl = jnp.pad(params[-1]["b"], (0, co_pad - coutL)).reshape(1, co_pad)

    y = fused_forward(patches0, w0, s0, mids, wl, bl, co_pad)      # (N, co_pad)
    return y[:, :coutL].reshape(N, coutL, 1, 1)


# ----------------------------- References ------------------------------------
def forward_ref_matched(params, specs, x_nchw, use_coord_conv=True, eps=1e-5):
    """Same numerics as the Pallas path (bf16 conv inputs, f32 accumulation,
    bf16 inter-layer activations, eval-mode BN folded)."""
    if use_coord_conv:
        x_nchw = cat_coord(x_nchw)
    x = x_nchw.astype(jnp.bfloat16)
    for p, (cin, cout, k, s, pad, has_bn) in zip(params, specs):
        scale, shift = _fold_bn(p, has_bn, eps)
        w = (p["w"] * scale[:, None, None, None]).astype(jnp.bfloat16)
        y = jax.lax.conv_general_dilated(
            x, w, (s, s), ((pad, pad), (pad, pad)),
            dimension_numbers=("NCHW", "OIHW", "NCHW"),
            preferred_element_type=jnp.float32)
        y = y + shift.reshape(1, -1, 1, 1)
        if has_bn:
            y = jnp.where(y > 0, y, 0.2 * y)
            x = y.astype(jnp.bfloat16)
        else:
            x = y
    return x


def forward_ref_f32(params, specs, x_nchw, use_coord_conv=True, eps=1e-5):
    """Full-precision semantic reference (eval-mode BN)."""
    if use_coord_conv:
        x_nchw = cat_coord(x_nchw)
    x = x_nchw
    for p, (cin, cout, k, s, pad, has_bn) in zip(params, specs):
        x = jax.lax.conv_general_dilated(
            x, p["w"], (s, s), ((pad, pad), (pad, pad)),
            dimension_numbers=("NCHW", "OIHW", "NCHW"))
        x = x + p["b"].reshape(1, -1, 1, 1)
        if has_bn:
            scale = (p["gamma"] / jnp.sqrt(p["var"] + eps)).reshape(1, -1, 1, 1)
            shift = (p["beta"] - p["gamma"] * p["mean"]
                     / jnp.sqrt(p["var"] + eps)).reshape(1, -1, 1, 1)
            x = x * scale + shift
            x = jnp.where(x > 0, x, 0.2 * x)
    return x


if __name__ == "__main__":
    # Small shapes consistent with the module: batch=2, channels=6, spatial=16.
    batch, in_ch, in_size, out_size = 2, 6, 16, 90
    use_coord = True

    key = jax.random.PRNGKey(0)
    kx, kp = jax.random.split(key)
    x = jax.random.normal(kx, (batch, in_ch, in_size, in_size), jnp.float32)

    specs = build_layer_specs(in_ch, in_size, out_size, use_coord)
    params = init_params(kp, specs)

    out = jax.block_until_ready(forward_pallas(params, specs, x, use_coord))
    assert out.shape == (batch, out_size, 1, 1), out.shape

    # Tight check vs. a precision-matched JAX reference (same bf16 casts).
    ref_m = jax.block_until_ready(forward_ref_matched(params, specs, x, use_coord))
    err_m = float(jnp.max(jnp.abs(out - ref_m)))
    assert jnp.allclose(out, ref_m, atol=3e-3, rtol=3e-3), err_m

    # Loose sanity band vs. the full-f32 reference (bf16 matmul inputs).
    ref_f = jax.block_until_ready(forward_ref_f32(params, specs, x, use_coord))
    err_f = float(jnp.max(jnp.abs(out - ref_f)))
    assert jnp.allclose(out, ref_f, atol=1e-1, rtol=5e-2), err_f

    print("KERNEL_OK")
</pallas_src>

<mosaic_0001>
module attributes {stable_mosaic.version = 11 : i64} {
  func.func @_fused_net_kernel(%arg0: i32, %arg1: memref<1x64x128xbf16, #tpu.memory_space<vmem>>, %arg2: memref<128x128xbf16, #tpu.memory_space<vmem>>, %arg3: memref<1x128xf32, #tpu.memory_space<vmem>>, %arg4: memref<256x64xbf16, #tpu.memory_space<vmem>>, %arg5: memref<2048x128xbf16, #tpu.memory_space<vmem>>, %arg6: memref<1x128xf32, #tpu.memory_space<vmem>>, %arg7: memref<2048x128xbf16, #tpu.memory_space<vmem>>, %arg8: memref<1x128xf32, #tpu.memory_space<vmem>>, %arg9: memref<1x1x128xf32, #tpu.memory_space<vmem>>) attributes {dimension_semantics = [#tpu.dimension_semantics<parallel>], iteration_bounds = array<i64: 2>, scalar_prefetch = 0 : i64, scratch_operands = 0 : i64, tpu.core_type = #tpu.core_type<tc>, window_params = [{transform_indices = @transform_0, window_bounds = array<i64: 1, 64, 128>}, {pipeline_mode = #tpu.pipeline_mode<synchronous>, transform_indices = @transform_1, window_bounds = array<i64: 128, 128>}, {pipeline_mode = #tpu.pipeline_mode<synchronous>, transform_indices = @transform_2, window_bounds = array<i64: 1, 128>}, {pipeline_mode = #tpu.pipeline_mode<synchronous>, transform_indices = @transform_3, window_bounds = array<i64: 256, 64>}, {pipeline_mode = #tpu.pipeline_mode<synchronous>, transform_indices = @transform_4, window_bounds = array<i64: 2048, 128>}, {pipeline_mode = #tpu.pipeline_mode<synchronous>, transform_indices = @transform_5, window_bounds = array<i64: 1, 128>}, {pipeline_mode = #tpu.pipeline_mode<synchronous>, transform_indices = @transform_6, window_bounds = array<i64: 2048, 128>}, {pipeline_mode = #tpu.pipeline_mode<synchronous>, transform_indices = @transform_7, window_bounds = array<i64: 1, 128>}, {transform_indices = @transform_8, window_bounds = array<i64: 1, 1, 128>}]} {
    %c0 = arith.constant 0 : index
    %c0_0 = arith.constant 0 : index
    %c0_1 = arith.constant 0 : index
    %0 = vector.load %arg1[%c0, %c0_0, %c0_1] : memref<1x64x128xbf16, #tpu.memory_space<vmem>>, vector<1x64x128xbf16>
    %1 = vector.shape_cast %0 : vector<1x64x128xbf16> to vector<64x128xbf16>
    %c0_2 = arith.constant 0 : index
    %c0_3 = arith.constant 0 : index
    %2 = vector.load %arg2[%c0_2, %c0_3] : memref<128x128xbf16, #tpu.memory_space<vmem>>, vector<128x128xbf16>
    %cst = arith.constant dense<0.000000e+00> : vector<64x128xf32>
    %3 = tpu.matmul %1, %2, %cst {dimension_numbers = #tpu.dot_dimension_numbers<[1], [0], [0], [1], [0, 0, 1, 1], [], []>} : vector<64x128xbf16>, vector<128x128xbf16>, vector<64x128xf32> -> vector<64x128xf32>
    %c0_4 = arith.constant 0 : index
    %c0_5 = arith.constant 0 : index
    %4 = vector.load %arg3[%c0_4, %c0_5] : memref<1x128xf32, #tpu.memory_space<vmem>>, vector<1x128xf32>
    %5 = vector.broadcast %4 : vector<1x128xf32> to vector<64x128xf32>
    %6 = arith.addf %3, %5 : vector<64x128xf32>
    %cst_6 = arith.constant 0.000000e+00 : f32
    %7 = vector.broadcast %cst_6 : f32 to vector<64x128xf32>
    %8 = arith.cmpf ogt, %6, %7 : vector<64x128xf32>
    %cst_7 = arith.constant 2.000000e-01 : f32
    %9 = vector.broadcast %cst_7 : f32 to vector<64x128xf32>
    %10 = arith.mulf %9, %6 : vector<64x128xf32>
    %11 = arith.select %8, %6, %10 : vector<64x128xi1>, vector<64x128xf32>
    %12 = arith.truncf %11 : vector<64x128xf32> to vector<64x128xbf16>
    %c0_8 = arith.constant 0 : index
    %c0_9 = arith.constant 0 : index
    %13 = vector.load %arg4[%c0_8, %c0_9] : memref<256x64xbf16, #tpu.memory_space<vmem>>, vector<256x64xbf16>
    %cst_10 = arith.constant dense<0.000000e+00> : vector<256x128xf32>
    %14 = tpu.matmul %13, %12, %cst_10 {dimension_numbers = #tpu.dot_dimension_numbers<[1], [0], [0], [1], [0, 0, 1, 1], [], []>} : vector<256x64xbf16>, vector<64x128xbf16>, vector<256x128xf32> -> vector<256x128xf32>
    %15 = arith.truncf %14 : vector<256x128xf32> to vector<256x128xbf16>
    %16 = vector.extract_strided_slice %15 {offsets = [0, 0], sizes = [16, 128], strides = [1, 1]} : vector<256x128xbf16> to vector<16x128xbf16>
    %17 = vector.extract_strided_slice %15 {offsets = [16, 0], sizes = [16, 128], strides = [1, 1]} : vector<256x128xbf16> to vector<16x128xbf16>
    %18 = vector.extract_strided_slice %15 {offsets = [32, 0], sizes = [16, 128], strides = [1, 1]} : vector<256x128xbf16> to vector<16x128xbf16>
    %19 = vector.extract_strided_slice %15 {offsets = [48, 0], sizes = [16, 128], strides = [1, 1]} : vector<256x128xbf16> to vector<16x128xbf16>
    %20 = vector.extract_strided_slice %15 {offsets = [64, 0], sizes = [16, 128], strides = [1, 1]} : vector<256x128xbf16> to vector<16x128xbf16>
    %21 = vector.extract_strided_slice %15 {offsets = [80, 0], sizes = [16, 128], strides = [1, 1]} : vector<256x128xbf16> to vector<16x128xbf16>
    %22 = vector.extract_strided_slice %15 {offsets = [96, 0], sizes = [16, 128], strides = [1, 1]} : vector<256x128xbf16> to vector<16x128xbf16>
    %23 = vector.extract_strided_slice %15 {offsets = [112, 0], sizes = [16, 128], strides = [1, 1]} : vector<256x128xbf16> to vector<16x128xbf16>
    %24 = vector.extract_strided_slice %15 {offsets = [128, 0], sizes = [16, 128], strides = [1, 1]} : vector<256x128xbf16> to vector<16x128xbf16>
    %25 = vector.extract_strided_slice %15 {offsets = [144, 0], sizes = [16, 128], strides = [1, 1]} : vector<256x128xbf16> to vector<16x128xbf16>
    %26 = vector.extract_strided_slice %15 {offsets = [160, 0], sizes = [16, 128], strides = [1, 1]} : vector<256x128xbf16> to vector<16x128xbf16>
    %27 = vector.extract_strided_slice %15 {offsets = [176, 0], sizes = [16, 128], strides = [1, 1]} : vector<256x128xbf16> to vector<16x128xbf16>
    %28 = vector.extract_strided_slice %15 {offsets = [192, 0], sizes = [16, 128], strides = [1, 1]} : vector<256x128xbf16> to vector<16x128xbf16>
    %29 = vector.extract_strided_slice %15 {offsets = [208, 0], sizes = [16, 128], strides = [1, 1]} : vector<256x128xbf16> to vector<16x128xbf16>
    %30 = vector.extract_strided_slice %15 {offsets = [224, 0], sizes = [16, 128], strides = [1, 1]} : vector<256x128xbf16> to vector<16x128xbf16>
    %31 = vector.extract_strided_slice %15 {offsets = [240, 0], sizes = [16, 128], strides = [1, 1]} : vector<256x128xbf16> to vector<16x128xbf16>
    %32 = tpu.concatenate %16, %17, %18, %19, %20, %21, %22, %23, %24, %25, %26, %27, %28, %29, %30, %31 in 1 : vector<16x128xbf16>, vector<16x128xbf16>, vector<16x128xbf16>, vector<16x128xbf16>, vector<16x128xbf16>, vector<16x128xbf16>, vector<16x128xbf16>, vector<16x128xbf16>, vector<16x128xbf16>, vector<16x128xbf16>, vector<16x128xbf16>, vector<16x128xbf16>, vector<16x128xbf16>, vector<16x128xbf16>, vector<16x128xbf16>, vector<16x128xbf16> -> vector<16x2048xbf16>
    %c0_11 = arith.constant 0 : index
    %c0_12 = arith.constant 0 : index
    %33 = vector.load %arg5[%c0_11, %c0_12] : memref<2048x128xbf16, #tpu.memory_space<vmem>>, vector<2048x128xbf16>
    %cst_13 = arith.constant dense<0.000000e+00> : vector<16x128xf32>
    %34 = tpu.matmul %32, %33, %cst_13 {dimension_numbers = #tpu.dot_dimension_numbers<[1], [0], [0], [1], [0, 0, 1, 1], [], []>} : vector<16x2048xbf16>, vector<2048x128xbf16>, vector<16x128xf32> -> vector<16x128xf32>
    %c0_14 = arith.constant 0 : index
    %c0_15 = arith.constant 0 : index
    %35 = vector.load %arg6[%c0_14, %c0_15] : memref<1x128xf32, #tpu.memory_space<vmem>>, vector<1x128xf32>
    %36 = vector.broadcast %35 : vector<1x128xf32> to vector<16x128xf32>
    %37 = arith.addf %34, %36 : vector<16x128xf32>
    %cst_16 = arith.constant 0.000000e+00 : f32
    %38 = vector.broadcast %cst_16 : f32 to vector<16x128xf32>
    %39 = arith.cmpf ogt, %37, %38 : vector<16x128xf32>
    %cst_17 = arith.constant 2.000000e-01 : f32
    %40 = vector.broadcast %cst_17 : f32 to vector<16x128xf32>
    %41 = arith.mulf %40, %37 : vector<16x128xf32>
    %42 = arith.select %39, %37, %41 : vector<16x128xi1>, vector<16x128xf32>
    %43 = arith.truncf %42 : vector<16x128xf32> to vector<16x128xbf16>
    %44 = vector.extract_strided_slice %43 {offsets = [0, 0], sizes = [1, 128], strides = [1, 1]} : vector<16x128xbf16> to vector<1x128xbf16>
    %45 = vector.extract_strided_slice %43 {offsets = [1, 0], sizes = [1, 128], strides = [1, 1]} : vector<16x128xbf16> to vector<1x128xbf16>
    %46 = vector.extract_strided_slice %43 {offsets = [2, 0], sizes = [1, 128], strides = [1, 1]} : vector<16x128xbf16> to vector<1x128xbf16>
    %47 = vector.extract_strided_slice %43 {offsets = [3, 0], sizes = [1, 128], strides = [1, 1]} : vector<16x128xbf16> to vector<1x128xbf16>
    %48 = vector.extract_strided_slice %43 {offsets = [4, 0], sizes = [1, 128], strides = [1, 1]} : vector<16x128xbf16> to vector<1x128xbf16>
    %49 = vector.extract_strided_slice %43 {offsets = [5, 0], sizes = [1, 128], strides = [1, 1]} : vector<16x128xbf16> to vector<1x128xbf16>
    %50 = vector.extract_strided_slice %43 {offsets = [6, 0], sizes = [1, 128], strides = [1, 1]} : vector<16x128xbf16> to vector<1x128xbf16>
    %51 = vector.extract_strided_slice %43 {offsets = [7, 0], sizes = [1, 128], strides = [1, 1]} : vector<16x128xbf16> to vector<1x128xbf16>
    %52 = vector.extract_strided_slice %43 {offsets = [8, 0], sizes = [1, 128], strides = [1, 1]} : vector<16x128xbf16> to vector<1x128xbf16>
    %53 = vector.extract_strided_slice %43 {offsets = [9, 0], sizes = [1, 128], strides = [1, 1]} : vector<16x128xbf16> to vector<1x128xbf16>
    %54 = vector.extract_strided_slice %43 {offsets = [10, 0], sizes = [1, 128], strides = [1, 1]} : vector<16x128xbf16> to vector<1x128xbf16>
    %55 = vector.extract_strided_slice %43 {offsets = [11, 0], sizes = [1, 128], strides = [1, 1]} : vector<16x128xbf16> to vector<1x128xbf16>
    %56 = vector.extract_strided_slice %43 {offsets = [12, 0], sizes = [1, 128], strides = [1, 1]} : vector<16x128xbf16> to vector<1x128xbf16>
    %57 = vector.extract_strided_slice %43 {offsets = [13, 0], sizes = [1, 128], strides = [1, 1]} : vector<16x128xbf16> to vector<1x128xbf16>
    %58 = vector.extract_strided_slice %43 {offsets = [14, 0], sizes = [1, 128], strides = [1, 1]} : vector<16x128xbf16> to vector<1x128xbf16>
    %59 = vector.extract_strided_slice %43 {offsets = [15, 0], sizes = [1, 128], strides = [1, 1]} : vector<16x128xbf16> to vector<1x128xbf16>
    %60 = tpu.concatenate %44, %45, %46, %47, %48, %49, %50, %51, %52, %53, %54, %55, %56, %57, %58, %59 in 1 : vector<1x128xbf16>, vector<1x128xbf16>, vector<1x128xbf16>, vector<1x128xbf16>, vector<1x128xbf16>, vector<1x128xbf16>, vector<1x128xbf16>, vector<1x128xbf16>, vector<1x128xbf16>, vector<1x128xbf16>, vector<1x128xbf16>, vector<1x128xbf16>, vector<1x128xbf16>, vector<1x128xbf16>, vector<1x128xbf16>, vector<1x128xbf16> -> vector<1x2048xbf16>
    %c0_18 = arith.constant 0 : index
    %c0_19 = arith.constant 0 : index
    %61 = vector.load %arg7[%c0_18, %c0_19] : memref<2048x128xbf16, #tpu.memory_space<vmem>>, vector<2048x128xbf16>
    %cst_20 = arith.constant dense<0.000000e+00> : vector<1x128xf32>
    %62 = tpu.matmul %60, %61, %cst_20 {dimension_numbers = #tpu.dot_dimension_numbers<[1], [0], [0], [1], [0, 0, 1, 1], [], []>} : vector<1x2048xbf16>, vector<2048x128xbf16>, vector<1x128xf32> -> vector<1x128xf32>
    %c0_21 = arith.constant 0 : index
    %c0_22 = arith.constant 0 : index
    %63 = vector.load %arg8[%c0_21, %c0_22] : memref<1x128xf32, #tpu.memory_space<vmem>>, vector<1x128xf32>
    %64 = arith.addf %62, %63 : vector<1x128xf32>
    %c0_23 = arith.constant 0 : index
    %c0_24 = arith.constant 0 : index
    %c0_25 = arith.constant 0 : index
    %65 = vector.load %arg9[%c0_23, %c0_24, %c0_25] : memref<1x1x128xf32, #tpu.memory_space<vmem>>, vector<1x1x128xf32>
    %66 = vector.shape_cast %65 : vector<1x1x128xf32> to vector<1x128xf32>
    %67 = vector.shape_cast %64 : vector<1x128xf32> to vector<1x1x128xf32>
    tpu.vector_store %arg9[%c0_23, %c0_24, %c0_25], %67 {strides = array<i32>} : memref<1x1x128xf32, #tpu.memory_space<vmem>>, vector<1x1x128xf32>,
    return
  }
  func.func @transform_0(%arg0: i32) -> (i32, i32, i32) {
    %c0_i32 = arith.constant 0 : i32
    %c0_i32_0 = arith.constant 0 : i32
    %c0_i32_1 = arith.constant 0 : i32
    return %arg0, %c0_i32, %c0_i32_0 : i32, i32, i32
  }
  func.func @transform_1(%arg0: i32) -> (i32, i32) {
    %c0_i32 = arith.constant 0 : i32
    %c0_i32_0 = arith.constant 0 : i32
    %c0_i32_1 = arith.constant 0 : i32
    return %c0_i32, %c0_i32_0 : i32, i32
  }
  func.func @transform_2(%arg0: i32) -> (i32, i32) {
    %c0_i32 = arith.constant 0 : i32
    %c0_i32_0 = arith.constant 0 : i32
    %c0_i32_1 = arith.constant 0 : i32
    return %c0_i32, %c0_i32_0 : i32, i32
  }
  func.func @transform_3(%arg0: i32) -> (i32, i32) {
    %c0_i32 = arith.constant 0 : i32
    %c0_i32_0 = arith.constant 0 : i32
    %c0_i32_1 = arith.constant 0 : i32
    return %c0_i32, %c0_i32_0 : i32, i32
  }
  func.func @transform_4(%arg0: i32) -> (i32, i32) {
    %c0_i32 = arith.constant 0 : i32
    %c0_i32_0 = arith.constant 0 : i32
    %c0_i32_1 = arith.constant 0 : i32
    return %c0_i32, %c0_i32_0 : i32, i32
  }
  func.func @transform_5(%arg0: i32) -> (i32, i32) {
    %c0_i32 = arith.constant 0 : i32
    %c0_i32_0 = arith.constant 0 : i32
    %c0_i32_1 = arith.constant 0 : i32
    return %c0_i32, %c0_i32_0 : i32, i32
  }
  func.func @transform_6(%arg0: i32) -> (i32, i32) {
    %c0_i32 = arith.constant 0 : i32
    %c0_i32_0 = arith.constant 0 : i32
    %c0_i32_1 = arith.constant 0 : i32
    return %c0_i32, %c0_i32_0 : i32, i32
  }
  func.func @transform_7(%arg0: i32) -> (i32, i32) {
    %c0_i32 = arith.constant 0 : i32
    %c0_i32_0 = arith.constant 0 : i32
    %c0_i32_1 = arith.constant 0 : i32
    return %c0_i32, %c0_i32_0 : i32, i32
  }
  func.func @transform_8(%arg0: i32) -> (i32, i32, i32) {
    %c0_i32 = arith.constant 0 : i32
    %c0_i32_0 = arith.constant 0 : i32
    %c0_i32_1 = arith.constant 0 : i32
    return %arg0, %c0_i32, %c0_i32_0 : i32, i32, i32
  }
}

</mosaic_0001>

<bundles_post_ra>
// kernel: forward_pallas.1
= control target key start
LH: loop header
LB: loop body
LE: loop exit
PB: predicated region body
PF: predicated region fallthrough
CT: control target
= control target key end

     0   :  { %13 = vsyncpa [#allocation3], 0  ;;  %s5866_s0 = inlined_call_operand.vmem [shape: bf16[2,64,128], index: 0, kind: input, shape index: {}]   ;;  %s5867_s1 = inlined_call_operand.vmem [shape: bf16[128,128], index: 1, kind: input, shape index: {}]   ;;  %s5868_s2 = inlined_call_operand.vmem [shape: f32[1,128], index: 2, kind: input, shape index: {}]   ;;  %s5869_s3 = inlined_call_operand.vmem [shape: bf16[256,64], index: 3, kind: input, shape index: {}]   ;;  %s5870_s4 = inlined_call_operand.vmem [shape: bf16[2048,128], index: 4, kind: input, shape index: {}]   ;;  %s5871_s5 = inlined_call_operand.vmem [shape: f32[1,128], index: 5, kind: input, shape index: {}]   ;;  %s5872_s6 = inlined_call_operand.vmem [shape: bf16[2048,128], index: 6, kind: input, shape index: {}]   ;;  %s5873_s7 = inlined_call_operand.vmem [shape: f32[1,128], index: 7, kind: input, shape index: {}]   ;;  %s5874_s8 = inlined_call_operand.hbm [shape: f32[2,1,128], index: 8, kind: output, shape index: {}]  }
   0x1   :  { %15 = vsyncpa [#allocation3 + $0x1], 0  ;;  %s4844_s27 = smov 0   ;;  %s4846_s28 = smov 0  }
   0x2   :  { %s4848_s29 = smov 0   ;;  %s4850_s30 = smov 0  }
   0x3 LB: > { %s4865_s9 = sadd.s32 4294967295, %s4796_s30   ;;  %s3651_s10 = sadd.s32 4294967294, %s4796_s30   ;;  %s4796_s30 = sphi %s4850_s30, %s5880_s30   ;;  %s4792_s29 = sphi %s4848_s29, %s5879_s29   ;;  %s4788_s28 = sphi %s4846_s28, %s5878_s28   ;;  %s4784_s27 = sphi %s4844_s27, %s5877_s27  }
   0x4   : > { %s4869_s11 = sadd.s32 1, %s4796_s30   ;;  %s201_s12 = sadd.s32 1, %s4792_s29 }
   0x5   : > { %s198_s13 = ssub.s32 %s4796_s30, %s4869_s11  ;;  %p211_p0 = scmp.ne.s32.totalorder %s4792_s29, %s4788_s28 }
   0x6   : > { %p199_p1 = scmp.eq.s32.totalorder %s198_s13, 0  ;;  %p212_p2 = scmp.eq.s32.totalorder %s4865_s9, 1 }
   0x7   : > { %p217_p3 = scmp.ne.s32.totalorder %s4788_s28, %s4784_s27  ;;  %p218_p4 = scmp.eq.s32.totalorder %s3651_s10, 1 }
   0x8   : > { %s4880_s14 = scalar_select %p199_p1, %s4792_s29, %s201_s12  }
   0x9   : > { %p4882_p5 = por %p212_p2, %p211_p0  ;;  %p4886_p6 = por %p218_p4, %p217_p3 }
   0xa   : > { %p3654_p7 = scmp.ge.s32.totalorder %s4796_s30, 1  ;;  %p265_p8 = scmp.lt.s32.totalorder %s4796_s30, 3 }
   0xc   : > { %p266_p9 = pnand %p3654_p7, %p265_p8 }
   0xd   : > { %v4450_v0 = vld [vmem:[%s5867_s1] sm:$0xff] (!%p266_p9)   ;;  %p298_p10 = scmp.lt.s32.totalorder (!%p266_p9), %s4865_s9, 1  ;;  %v4451_v1 = vld [vmem:[%s5867_s1 + $0x8] sm:$0xff] (!%p266_p9)   ;;  %v4452_v2 = vld [vmem:[%s5867_s1 + $0x10] sm:$0xff] (!%p266_p9)   ;;  %vm612_vm0 = vcmask (!%p266_p9), 523264   ;;  %s296_s17 = sand.u32 (!%p266_p9), 1, %s4788_s28  }
   0xe   : > { %269 = sbr.rel (%p266_p9) target bundleno = 1161 (0x489), region = 52  ;;  %4347 = vmatprep.subr.bf16.mxu0 (!%p266_p9), %v4450_v0  ;;  %v4453_v3 = vld [vmem:[%s5867_s1 + $0x18] sm:$0xff] (!%p266_p9)   ;;  %v4454_v5 = vld [vmem:[%s5867_s1 + $0x20] sm:$0xff] (!%p266_p9)   ;;  %v4455_v6 = vld [vmem:[%s5867_s1 + $0x28] sm:$0xff] (!%p266_p9)   ;;  %s3959_s18 = sshll.u32 (!%p266_p9), %s4865_s9, 4 }
   0xf   : > { %4348 = vmatpush3.bf16.msra.mxu0 (!%p266_p9), %v4450_v0  ;;  %v4456_v7 = vld [vmem:[%s5867_s1 + $0x30] sm:$0xff] (!%p266_p9)   ;;  %v4457_v8 = vld [vmem:[%s5867_s1 + $0x38] sm:$0xff] (!%p266_p9)   ;;  %v4462_v12 = vld [vmem:[%s5869_s3] sm:$0xff] (!%p266_p9)   ;;  %s297_s19 = scalar_lea.vmem (!%p266_p9), [#allocation2], %s296_s17  ;;  %s5824_s22 = scalar_lea.hbm (!%p266_p9), %s5874_s8, %s3959_s18 }
  0x10   : > { %4349 = vmatprep.subr.bf16.mxu0 (!%p266_p9), %v4451_v1  ;;  %4379 = vmatprep.mubr.msk.bf16.mxu1 (!%p266_p9), %vm612_vm0, %v4462_v12  ;;  %v4484_v13 = vld [vmem:[%s5870_s4 + $0x40] sm:$0xff] (!%p266_p9)   ;;  %v4488_v15 = vld [vmem:[%s5870_s4 + $0x48] sm:$0xff] (!%p266_p9)   ;;  %v4490_v17 = vld [vmem:[%s5870_s4 + $0x50] sm:$0xff] (!%p266_p9)   ;;  %s3596_s20 = sshll.u32 (!%p266_p9), %s297_s19, 4  ;;  %s3584_s23 = scalar_lea.sflag (!%p266_p9), [#allocation3], %s296_s17  ;;  %s5826_s20 = int_to_ptr.vmem [resolvable:$true] %s3596_s20 }
  0x11   : > { %v4486_v14 = vld [vmem:[%s5870_s4] sm:$0xff] (!%p266_p9)   ;;  %v4489_v16 = vld [vmem:[%s5870_s4 + $0x8] sm:$0xff] (!%p266_p9)   ;;  %v4492_v18 = vld [vmem:[%s5870_s4 + $0x10] sm:$0xff] (!%p266_p9)  }
  0x12   : > { %v4494_v19 = vld [vmem:[%s5870_s4 + $0x58] sm:$0xff] (!%p266_p9)   ;;  %v4496_v21 = vld [vmem:[%s5870_s4 + $0x60] sm:$0xff] (!%p266_p9)   ;;  %v4500_v23 = vld [vmem:[%s5870_s4 + $0x68] sm:$0xff] (!%p266_p9)  }
  0x13   : > { %4350 = vmatpush3.bf16.msra.mxu0 (!%p266_p9), %v4451_v1  ;;  %v4495_v20 = vld [vmem:[%s5870_s4 + $0x18] sm:$0xff] (!%p266_p9)   ;;  %v4498_v22 = vld [vmem:[%s5870_s4 + $0x20] sm:$0xff] (!%p266_p9)   ;;  %v4501_v24 = vld [vmem:[%s5870_s4 + $0x28] sm:$0xff] (!%p266_p9)  }
  0x14   : > { %4351 = vmatprep.subr.bf16.mxu0 (!%p266_p9), %v4452_v2  ;;  %v4502_v25 = vld [vmem:[%s5870_s4 + $0x70] sm:$0xff] (!%p266_p9)   ;;  %v3657_v27 = vld [vmem:[%s5868_s2] ss:$0 sm:$0xff] (!%p266_p9)  ;;  %v4463_v1 = vld [vmem:[%s5869_s3 + $0x8] sm:$0xff] (!%p266_p9)  }
  0x15   : > { %s299_s21 = scalar_select %p298_p10, %s4865_s9, 1  ;;  %v4504_v26 = vld [vmem:[%s5870_s4 + $0x30] sm:$0xff]   ;;  %v4478_v0 = vld [vmem:[%s5870_s4 + $0xc0] sm:$0xff]  }
  0x16   : > { %v4491_v12 = vld [vmem:[%s5870_s4 + $0xe0] sm:$0xff]   ;;  %s4734_s9 = scalar_lea.vmem %s5826_s20, 16 }
  0x17   : > { %s3962_s24 = sshll.u32 %s299_s21, 5  ;;  %4352 = vmatpush3.bf16.msra.mxu0 %v4452_v2  ;;  %v4464_v2 = vld [vmem:[%s5869_s3 + $0x10] sm:$0xff]   ;;  %p4735_p11 = scmp.ne.s32.totalorder %s5826_s20, %s4734_s9 }
  0x18   : > { %s302_s10 = scalar_lea.vmem %s5866_s0, %s3962_s24  ;;  %4353 = vmatprep.subr.bf16.mxu0 %v4453_v3  ;;  %s4798_s24 = smov [#allocation2]  }
  0x19   : > { %v4458_v4 = vld [vmem:[%s302_s10] sm:$0xff]   ;;  %v4459_v9 = vld [vmem:[%s302_s10 + $0x8] sm:$0xff]   ;;  %v4460_v10 = vld [vmem:[%s302_s10 + $0x10] sm:$0xff]   ;;  %p4736_p12 = pnand %p4735_p11, %p4882_p5  ;;  %s4738_s25 = sshll.u32 %s4798_s24, 4  ;;  %s4739_s25 = int_to_ptr.vmem [resolvable:$false] %s4738_s25 }
  0x1a   : > { %4363 = vmatprep.mubr.bf16.mxu0 %v4458_v4  ;;  %v4461_v11 = vld [vmem:[%s302_s10 + $0x18] sm:$0xff]   ;;  %v4480_v4 = vld [vmem:[%s5870_s4 + $0xc8] sm:$0xff]   ;;  %s4740_s26 = scalar_lea.vmem %s4739_s25, 32  ;;  %p4741_p0 = scmp.lt.s32.totalorder %s5826_s20, %s4739_s25 }
  0x1b   : > { %4354 = vmatpush3.bf16.msra.mxu0 %v4453_v3  ;;  %v4479_v3 = vld [vmem:[%s5870_s4 + $0x80] sm:$0xff]   ;;  %p4737_p13 = pneg %p4736_p12  ;;  %p4742_p1 = scmp.lt.s32.totalorder %s4740_s26, %s4734_s9 }
  0x1c   : > { %4355 = vmatprep.subr.bf16.mxu0 %v4454_v5 }
  0x1d   : > { %p4743_p2 = por %p4742_p1, %p4741_p0 }
  0x1f   : > { %4356 = vmatpush3.bf16.msra.mxu0 %v4454_v5  ;;  %v4481_v5 = vld [vmem:[%s5870_s4 + $0x88] sm:$0xff]   ;;  %p4744_p3 = pnand %p4743_p2, %p4737_p13 }
  0x20   : > { %4357 = vmatprep.subr.bf16.mxu0 %v4455_v6 }
  0x23   : > { %4358 = vmatpush3.bf16.msra.mxu0 %v4455_v6  ;;  %v4482_v6 = vld [vmem:[%s5870_s4 + $0xd0] sm:$0xff]  }
  0x24   : > { %4359 = vmatprep.subr.bf16.mxu0 %v4456_v7 }
  0x27   : > { %4360 = vmatpush3.bf16.msra.mxu0 %v4456_v7  ;;  %v4465_v7 = vld [vmem:[%s5869_s3 + $0x18] sm:$0xff]  }
  0x28   : > { %4361 = vmatprep.subr.bf16.mxu0 %v4457_v8 }
  0x2b   : > { %4362 = vmatpush3.bf16.msra.mxu0 %v4457_v8  ;;  %v4466_v8 = vld [vmem:[%s5869_s3 + $0x20] sm:$0xff]  }
  0x2c   : > { %3995 = vmatprep.subr.bf16.mxu0 %v4484_v13  ;;  %v4467_v13 = vld [vmem:[%s5869_s3 + $0x28] sm:$0xff]  }
  0x2e   : > { %4364 = vmatmul.mubr.bf16.vlgmr.msra.gmra.mrb[0].mxu0 %v4459_v9  ;;  %v4483_v9 = vld [vmem:[%s5870_s4 + $0x90] sm:$0xff]  }
  0x2f   : > { %4367 = vmatprep.mubr.bf16.mxu0 %v4460_v10  ;;  %3996 = vmatpush3.bf16.msra.mxu0 %v4486_v14  ;;  %v4485_v10 = vld [vmem:[%s5870_s4 + $0xd8] sm:$0xff]   ;;  %v4468_v14 = vld [vmem:[%s5869_s3 + $0x30] sm:$0xff]  }
  0x30   : > { %3997 = vmatprep.subr.bf16.mxu0 %v4488_v15  ;;  %v4493_v15 = vld [vmem:[%s5870_s4 + $0xa0] sm:$0xff]  }
  0x33   : > { %3998 = vmatpush3.bf16.msra.mxu0 %v4489_v16  ;;  %v4497_v16 = vld [vmem:[%s5870_s4 + $0xe8] sm:$0xff]  }
  0x34   : > { %3999 = vmatprep.subr.bf16.mxu0 %v4490_v17  ;;  %v4499_v17 = vld [vmem:[%s5870_s4 + $0xa8] sm:$0xff]  }
  0x36   : > { %4368 = vmatmul.mubr.bf16.gmra.mrb[4].mxu0 %v4461_v11  ;;  %v4487_v11 = vld [vmem:[%s5870_s4 + $0x98] sm:$0xff]  }
  0x37   : > { %4000 = vmatpush3.bf16.msra.mxu0 %v4492_v18  ;;  %v4503_v18 = vld [vmem:[%s5870_s4 + $0xf0] sm:$0xff]  }
  0x38   : > { %4001 = vmatprep.subr.bf16.mxu0 %v4494_v19  ;;  %v4469_v19 = vld [vmem:[%s5869_s3 + $0x38] sm:$0xff]  }
  0x3b   : > { %4002 = vmatpush3.bf16.msra.mxu0 %v4495_v20  ;;  %v4470_v20 = vld [vmem:[%s5869_s3 + $0x40] sm:$0xff]  }
  0x3c   : > { %4003 = vmatprep.subr.bf16.mxu0 %v4496_v21  ;;  %v4505_v21 = vld [vmem:[%s5870_s4 + $0xb0] sm:$0xff]  }
  0x3f   : > { %4004 = vmatpush3.bf16.msra.mxu0 %v4498_v22  ;;  %v4471_v22 = vld [vmem:[%s5869_s3 + $0x48] sm:$0xff]  }
  0x40   : > { %4005 = vmatprep.subr.bf16.mxu0 %v4500_v23  ;;  %v4472_v23 = vld [vmem:[%s5869_s3 + $0x50] sm:$0xff]  }
  0x43   : > { %4006 = vmatpush3.bf16.msra.mxu0 %v4501_v24  ;;  %v4473_v24 = vld [vmem:[%s5869_s3 + $0x58] sm:$0xff]  }
  0x44   : > { %4007 = vmatprep.subr.bf16.mxu0 %v4502_v25  ;;  %v4474_v25 = vld [vmem:[%s5869_s3 + $0x60] sm:$0xff]  }
  0x47   : > { %4008 = vmatpush3.bf16.msra.mxu0 %v4504_v26  ;;  %v4475_v26 = vld [vmem:[%s5869_s3 + $0x68] sm:$0xff]  }
 0x101   : > { %v4365_v28 = vpop.f32.mrb[0].mxu0 }
 0x102   : > { %v450_v29 = vadd.f32 %v4365_v28, %v3657_v27  ;;  %v441_v30 = vpop.f32.mrb[1].mxu0  ;;  %v4477_v28 = vld [vmem:[%s5869_s3 + $0x78] sm:$0xff]  }
 0x103   : > { %v442_v31 = vadd.f32 %v3657_v27, %v441_v30  ;;  %v4366_v32 = vpop.f32.mrb[2].mxu0  ;;  %v4507_v30 = vld [vmem:[%s5870_s4 + $0x38] sm:$0xff]  }
 0x104   : > { %v482_v33 = vmul.f32 0.2, %v450_v29  ;;  %v453_v34 = vadd.f32 %v4366_v32, %v3657_v27  ;;  %v444_v35 = vpop.f32.mrb[3].mxu0  ;;  %vm474_vm1 = vcmp.gt.f32.partialorder %v450_v29, 0.0  ;;  %v4508_v32 = vld [vmem:[%s5870_s4 + $0xf8] sm:$0xff]  }
 0x105   : > { %v480_v36 = vmul.f32 0.2, %v442_v31  ;;  %v445_v37 = vadd.f32 %v3657_v27, %v444_v35  ;;  %vm472_vm3 = vcmp.gt.f32.partialorder %v442_v31, 0.0 }
 0x106   : > { %vm475_vm2 = vcmp.gt.f32.partialorder %v453_v34, 0.0  ;;  %v483_v38 = vmul.f32 0.2, %v453_v34  ;;  %v490_v40 = vsel %vm474_vm1, %v450_v29, %v482_v33  ;;  %v4506_v29 = vld [vmem:[%s5870_s4 + $0x78] sm:$0xff]  }
 0x107   : > { %v481_v39 = vmul.f32 0.2, %v445_v37  ;;  %vm473_vm4 = vcmp.gt.f32.partialorder %v445_v37, 0.0  ;;  %v488_v43 = vsel %vm472_vm3, %v442_v31, %v480_v36  ;;  %4009 = vmatprep.subr.bf16.mxu0 %v4506_v29  ;;  %v4509_v31 = vld [vmem:[%s5870_s4 + $0x140] sm:$0xff]   ;;  %v4510_v33 = vld [vmem:[%s5870_s4 + $0xb8] sm:$0xff]  }
 0x108   : > { %v491_v41 = vsel %vm475_vm2, %v453_v34, %v483_v38  ;;  %4010 = vmatpush3.bf16.msra.mxu0 %v4507_v30  ;;  %v4515_v34 = vld [vmem:[%s5870_s4 + $0x1c0] sm:$0xff]   ;;  %v4542_v30 = vld [vmem:[%s5870_s4 + $0x1f8] sm:$0xff]  }
 0x109   : > { %v4369_v42 = vpop.f32.mrb[4].mxu0  ;;  %v489_v44 = vsel %vm473_vm4, %v445_v37, %v481_v39  ;;  %v497_v45 = vpack.c.bf16 %v491_v41, %v490_v40  ;;  %4039 = vmatprep.subr.bf16.mxu0 %v4509_v31  ;;  %v4511_v40 = vld [vmem:[%s5870_s4 + $0x100] sm:$0xff]   ;;  %v4543_v31 = vld [vmem:[%s5870_s4 + $0x248] sm:$0xff]  }
 0x10a   : > { %v466_v46 = vadd.f32 %v4369_v42, %v3657_v27  ;;  %v457_v47 = vpop.f32.mrb[5].mxu0  ;;  %v496_v48 = vpack.c.bf16 %v489_v44, %v488_v43  ;;  %v4512_v42 = vld [vmem:[%s5870_s4 + $0x148] sm:$0xff]  }
 0x10b   : > { %v458_v49 = vadd.f32 %v3657_v27, %v457_v47  ;;  %v4370_v50 = vpop.f32.mrb[6].mxu0  ;;  %v4513_v43 = vld [vmem:[%s5870_s4 + $0x108] sm:$0xff]  }
 0x10c   : > { %v486_v51 = vmul.f32 0.2, %v466_v46  ;;  %v469_v52 = vadd.f32 %v4370_v50, %v3657_v27  ;;  %v460_v53 = vpop.f32.mrb[7].mxu0  ;;  %4371 = vmatprep.subr.bf16.mxu1 %v496_v48  ;;  %vm478_vm5 = vcmp.gt.f32.partialorder %v466_v46, 0.0  ;;  %v4516_v50 = vld [vmem:[%s5870_s4 + $0x110] sm:$0xff]  }
 0x10d   : > { %v484_v54 = vmul.f32 0.2, %v458_v49  ;;  %v461_v55 = vadd.f32 %v3657_v27, %v460_v53  ;;  %4372 = vmatpush3.bf16.msra.mxu1 %v496_v48  ;;  %vm476_vm6 = vcmp.gt.f32.partialorder %v458_v49, 0.0  ;;  %v4476_v27 = vld [vmem:[%s5869_s3 + $0x70] sm:$0xff]   ;;  %v4518_v53 = vld [vmem:[%s5870_s4 + $0x158] sm:$0xff]  }
 0x10e   : > { %vm479_vm7 = vcmp.gt.f32.partialorder %v469_v52, 0.0  ;;  %v487_v56 = vmul.f32 0.2, %v469_v52  ;;  %4373 = vmatprep.subr.bf16.mxu1 %v497_v45  ;;  %v494_v58 = vsel %vm478_vm5, %v466_v46, %v486_v51  ;;  %v4517_v51 = vld [vmem:[%s5870_s4 + $0x180] sm:$0xff]  }
 0x10f   : > { %vm477_vm8 = vcmp.gt.f32.partialorder %v461_v55, 0.0  ;;  %v485_v57 = vmul.f32 0.2, %v461_v55  ;;  %v492_v60 = vsel %vm476_vm6, %v458_v49, %v484_v54  ;;  %v4519_v54 = vld [vmem:[%s5870_s4 + $0x1c8] sm:$0xff]  }
 0x110   : > { %v495_v59 = vsel %vm479_vm7, %v469_v52, %v487_v56  ;;  %v4521_v56 = vld [vmem:[%s5870_s4 + $0x188] sm:$0xff]  }
 0x111   : > { %4374 = vmatpush3.bf16.msra.mxu1 %v497_v45  ;;  %v493_v61 = vsel %vm477_vm8, %v461_v55, %v485_v57  ;;  %v499_v62 = vpack.c.bf16 %v495_v59, %v494_v58  ;;  %v4514_v45 = vld [vmem:[%s5870_s4 + $0x150] sm:$0xff]   ;;  %v4520_v55 = vld [vmem:[%s5870_s4 + $0x118] sm:$0xff]   ;;  %v4522_v57 = vld [vmem:[%s5870_s4 + $0x160] sm:$0xff]  }
 0x112   : > { %v498_v63 = vpack.c.bf16 %v493_v61, %v492_v60  ;;  %v4523_v58 = vld [vmem:[%s5870_s4 + $0x1d0] sm:$0xff]  }
 0x114   : > { %4375 = vmatprep.subr.bf16.mxu1 %v498_v63 }
 0x115   : > { %4376 = vmatpush3.bf16.msra.mxu1 %v498_v63  ;;  %v4525_v63 = vld [vmem:[%s5870_s4 + $0x190] sm:$0xff]  }
 0x116   : > { %4377 = vmatprep.subr.bf16.mxu1 %v499_v62 }
 0x119   : > { %4378 = vmatpush3.bf16.msra.mxu1 %v499_v62  ;;  %v4524_v62 = vld [vmem:[%s5870_s4 + $0x120] sm:$0xff]  }
 0x11a   : > { %4017 = vmatprep.subr.bf16.mxu1 %v4478_v0 }
 0x11c   : > { %4380 = vmatmul.mubr.msk.bf16.vlgmr.msra.gmra.mrb[0].mxu1 %vm612_vm0, %v4463_v1 }
 0x11d   : > { %4383 = vmatprep.mubr.msk.bf16.mxu1 %vm612_vm0, %v4464_v2  ;;  %4018 = vmatpush3.bf16.msra.mxu1 %v4479_v3  ;;  %v4526_v2 = vld [vmem:[%s5870_s4 + $0x168] sm:$0xff]   ;;  %v4527_v3 = vld [vmem:[%s5870_s4 + $0x1d8] sm:$0xff]  }
 0x11e   : > { %4019 = vmatprep.subr.bf16.mxu1 %v4480_v4 }
 0x121   : > { %4020 = vmatpush3.bf16.msra.mxu1 %v4481_v5  ;;  %v4528_v5 = vld [vmem:[%s5870_s4 + $0x128] sm:$0xff]  }
 0x122   : > { %4021 = vmatprep.subr.bf16.mxu1 %v4482_v6  ;;  %v4529_v6 = vld [vmem:[%s5870_s4 + $0x198] sm:$0xff]  }
 0x124   : > { %4384 = vmatmul.mubr.msk.bf16.gmra.mrb[4].mxu1 %vm612_vm0, %v4465_v7  ;;  %v4530_v7 = vld [vmem:[%s5870_s4 + $0x170] sm:$0xff]  }
 0x125   : > { %4387 = vmatprep.mubr.msk.bf16.mxu1 %vm612_vm0, %v4466_v8  ;;  %4022 = vmatpush3.bf16.msra.mxu1 %v4483_v9  ;;  %v4531_v8 = vld [vmem:[%s5870_s4 + $0x1e0] sm:$0xff]  }
 0x126   : > { %4023 = vmatprep.subr.bf16.mxu1 %v4485_v10 }
 0x129   : > { %4024 = vmatpush3.bf16.msra.mxu1 %v4487_v11 }
 0x12a   : > { %4025 = vmatprep.subr.bf16.mxu1 %v4491_v12  ;;  %v4532_v12 = vld [vmem:[%s5870_s4 + $0x130] sm:$0xff]  }
 0x12c   : > { %4388 = vmatmul.mubr.msk.bf16.gmra.mrb[8].mxu1 %vm612_vm0, %v4467_v13  ;;  %v4533_v13 = vld [vmem:[%s5870_s4 + $0x1a0] sm:$0xff]  }
 0x12d   : > { %4391 = vmatprep.mubr.msk.bf16.mxu1 %vm612_vm0, %v4468_v14  ;;  %4026 = vmatpush3.bf16.msra.mxu1 %v4493_v15 }
 0x12e   : > { %4027 = vmatprep.subr.bf16.mxu1 %v4497_v16  ;;  %v4534_v16 = vld [vmem:[%s5870_s4 + $0x178] sm:$0xff]  }
 0x131   : > { %4028 = vmatpush3.bf16.msra.mxu1 %v4499_v17  ;;  %v4535_v17 = vld [vmem:[%s5870_s4 + $0x1e8] sm:$0xff]  }
 0x132   : > { %4029 = vmatprep.subr.bf16.mxu1 %v4503_v18 }
 0x134   : > { %4392 = vmatmul.mubr.msk.bf16.gmra.mrb[12].mxu1 %vm612_vm0, %v4469_v19  ;;  %v4536_v19 = vld [vmem:[%s5870_s4 + $0x138] sm:$0xff]  }
 0x135   : > { %4395 = vmatprep.mubr.msk.bf16.mxu1 %vm612_vm0, %v4470_v20  ;;  %4030 = vmatpush3.bf16.msra.mxu1 %v4505_v21  ;;  %v4537_v20 = vld [vmem:[%s5870_s4 + $0x1a8] sm:$0xff]   ;;  %v4538_v21 = vld [vmem:[%s5870_s4 + $0x1f0] sm:$0xff]  }
 0x136   : > { %4031 = vmatprep.subr.bf16.mxu1 %v4508_v32 }
 0x139   : > { %4032 = vmatpush3.bf16.msra.mxu1 %v4510_v33  ;;  %v4544_v33 = vld [vmem:[%s5870_s4 + $0x1b8] sm:$0xff]  }
 0x13a   : > { %4061 = vmatprep.subr.bf16.mxu1 %v4515_v34  ;;  %v4545_v34 = vld [vmem:[%s5870_s4 + $0x208] sm:$0xff]  }
 0x13c   : > { %4396 = vmatmul.mubr.msk.bf16.gmra.mrb[16].mxu1 %vm612_vm0, %v4471_v22  ;;  %v4539_v22 = vld [vmem:[%s5870_s4 + $0x240] sm:$0xff]  }
 0x13d   : > { %4399 = vmatprep.mubr.msk.bf16.mxu1 %vm612_vm0, %v4472_v23 }
 0x144   : > { %4400 = vmatmul.mubr.msk.bf16.gmra.mrb[20].mxu1 %vm612_vm0, %v4473_v24 }
 0x145   : > { %4403 = vmatprep.mubr.msk.bf16.mxu1 %vm612_vm0, %v4474_v25 }
 0x14c   : > { %4404 = vmatmul.mubr.msk.bf16.gmra.mrb[24].mxu1 %vm612_vm0, %v4475_v26  ;;  %v4540_v26 = vld [vmem:[%s5870_s4 + $0x1b0] sm:$0xff]  }
 0x14d   : > { %4407 = vmatprep.mubr.msk.bf16.mxu1 %vm612_vm0, %v4476_v27  ;;  %v4541_v27 = vld [vmem:[%s5870_s4 + $0x200] sm:$0xff]  }
 0x154   : > { %4408 = vmatmul.mubr.msk.bf16.gmra.mrb[28].mxu1 %vm612_vm0, %v4477_v28 }
 0x1ef   : > { %v4381_v35 = vpop.f32.mrb[0].mxu1 }
 0x1f0   : > { %v695_v36 = vpop.f32.mrb[1].mxu1 }
 0x1f1   : > { %v4382_v37 = vpop.f32.mrb[2].mxu1 }
 0x1f2   : > { %v823_v38 = vpack.c.bf16 %v4382_v37, %v4381_v35  ;;  %v698_v39 = vpop.f32.mrb[3].mxu1  ;;  %v4546_v35 = vld [vmem:[%s5870_s4 + $0x250] sm:$0xff]  }
 0x1f3   : > { %v822_v41 = vpack.c.bf16 %v698_v39, %v695_v36  ;;  %v4547_v36 = vld [vmem:[%s5870_s4 + $0x2c0] sm:$0xff]  }
 0x1f4   : > { %1901 = vmatprep.mubr.bf16.mxu0 %v823_v38 }
 0x1f5   : > { %1902 = vmatmul.mubr.bf16.vlgmr.msra.gmra.mrb[8].mxu0 %v822_v41  ;;  %v4549_v41 = vld [vmem:[%s5870_s4 + $0x280] sm:$0xff]  }
 0x1f6   : > { %4040 = vmatpush3.bf16.msra.mxu0 %v4511_v40  ;;  %v4548_v40 = vld [vmem:[%s5870_s4 + $0x210] sm:$0xff]  }
 0x1f7   : > { %v4385_v44 = vpop.f32.mrb[4].mxu1  ;;  %4041 = vmatprep.subr.bf16.mxu0 %v4512_v42 }
 0x1f8   : > { %v711_v46 = vpop.f32.mrb[5].mxu1 }
 0x1f9   : > { %v4386_v47 = vpop.f32.mrb[6].mxu1 }
 0x1fa   : > { %v825_v48 = vpack.c.bf16 %v4386_v47, %v4385_v44  ;;  %4042 = vmatpush3.bf16.msra.mxu0 %v4513_v43  ;;  %v714_v49 = vpop.f32.mrb[7].mxu1  ;;  %v4550_v44 = vld [vmem:[%s5870_s4 + $0x258] sm:$0xff]  }
 0x1fb   : > { %v824_v52 = vpack.c.bf16 %v714_v49, %v711_v46  ;;  %4043 = vmatprep.subr.bf16.mxu0 %v4514_v45  ;;  %v4551_v45 = vld [vmem:[%s5870_s4 + $0x2c8] sm:$0xff]   ;;  %v4552_v47 = vld [vmem:[%s5870_s4 + $0x218] sm:$0xff]   ;;  %v4554_v49 = vld [vmem:[%s5870_s4 + $0x260] sm:$0xff]  }
 0x1fc   : > { %1942 = vmatprep.mubr.bf16.mxu1 %v825_v48  ;;  %v4553_v48 = vld [vmem:[%s5870_s4 + $0x288] sm:$0xff]  }
 0x1fd   : > { %1943 = vmatmul.mubr.bf16.vlgmr.msra.gmra.mrb[32].mxu1 %v824_v52 }
 0x1fe   : > { %4044 = vmatpush3.bf16.msra.mxu0 %v4516_v50  ;;  %4062 = vmatpush3.bf16.msra.mxu1 %v4517_v51  ;;  %v4555_v50 = vld [vmem:[%s5870_s4 + $0x2d0] sm:$0xff]  }
 0x1ff   : > { %4045 = vmatprep.subr.bf16.mxu0 %v4518_v53  ;;  %4063 = vmatprep.subr.bf16.mxu1 %v4519_v54  ;;  %v4389_v59 = vpop.f32.mrb[8].mxu1  ;;  %v4556_v54 = vld [vmem:[%s5870_s4 + $0x220] sm:$0xff]  }
 0x200   : > { %v727_v60 = vpop.f32.mrb[9].mxu1 }
 0x201   : > { %v4390_v61 = vpop.f32.mrb[10].mxu1 }
 0x202   : > { %4046 = vmatpush3.bf16.msra.mxu0 %v4520_v55  ;;  %4064 = vmatpush3.bf16.msra.mxu1 %v4521_v56  ;;  %v827_v0 = vpack.c.bf16 %v4390_v61, %v4389_v59  ;;  %v730_v1 = vpop.f32.mrb[11].mxu1  ;;  %v4557_v55 = vld [vmem:[%s5870_s4 + $0x290] sm:$0xff]   ;;  %v4559_v59 = vld [vmem:[%s5870_s4 + $0x2d8] sm:$0xff]   ;;  %v4560_v61 = vld [vmem:[%s5870_s4 + $0x228] sm:$0xff]  }
 0x203   : > { %4047 = vmatprep.subr.bf16.mxu0 %v4522_v57  ;;  %4065 = vmatprep.subr.bf16.mxu1 %v4523_v58  ;;  %v826_v4 = vpack.c.bf16 %v730_v1, %v727_v60  ;;  %v4558_v58 = vld [vmem:[%s5870_s4 + $0x268] sm:$0xff]  }
 0x204   : > { %1983 = vmatprep.mubr.bf16.mxu0 %v827_v0  ;;  %v4563_v0 = vld [vmem:[%s5870_s4 + $0x2e0] sm:$0xff]  }
 0x206   : > { %4048 = vmatpush3.bf16.msra.mxu0 %v4524_v62  ;;  %4066 = vmatpush3.bf16.msra.mxu1 %v4525_v63  ;;  %v4561_v62 = vld [vmem:[%s5870_s4 + $0x298] sm:$0xff]   ;;  %v4562_v63 = vld [vmem:[%s5870_s4 + $0x270] sm:$0xff]  }
 0x207   : > { %4049 = vmatprep.subr.bf16.mxu0 %v4526_v2  ;;  %4067 = vmatprep.subr.bf16.mxu1 %v4527_v3  ;;  %v4393_v9 = vpop.f32.mrb[12].mxu1 }
 0x208   : > { %v743_v10 = vpop.f32.mrb[13].mxu1 }
 0x209   : > { %v4394_v11 = vpop.f32.mrb[14].mxu1 }
 0x20a   : > { %4050 = vmatpush3.bf16.msra.mxu0 %v4528_v5  ;;  %4068 = vmatpush3.bf16.msra.mxu1 %v4529_v6  ;;  %v829_v14 = vpack.c.bf16 %v4394_v11, %v4393_v9  ;;  %v746_v15 = vpop.f32.mrb[15].mxu1  ;;  %v4565_v5 = vld [vmem:[%s5870_s4 + $0x2a0] sm:$0xff]   ;;  %v4567_v9 = vld [vmem:[%s5870_s4 + $0x2e8] sm:$0xff]   ;;  %v4568_v11 = vld [vmem:[%s5870_s4 + $0x238] sm:$0xff]  }
 0x20b   : > { %4051 = vmatprep.subr.bf16.mxu0 %v4530_v7  ;;  %4069 = vmatprep.subr.bf16.mxu1 %v4531_v8  ;;  %v828_v18 = vpack.c.bf16 %v746_v15, %v743_v10  ;;  %v4566_v8 = vld [vmem:[%s5870_s4 + $0x278] sm:$0xff]   ;;  %v4572_v15 = vld [vmem:[%s5870_s4 + $0x2b0] sm:$0xff]  }
 0x20c   : > { %2024 = vmatprep.mubr.bf16.mxu1 %v829_v14  ;;  %v4571_v14 = vld [vmem:[%s5870_s4 + $0x340] sm:$0xff]  }
 0x20e   : > { %4052 = vmatpush3.bf16.msra.mxu0 %v4532_v12  ;;  %4070 = vmatpush3.bf16.msra.mxu1 %v4533_v13  ;;  %v4569_v12 = vld [vmem:[%s5870_s4 + $0x2a8] sm:$0xff]   ;;  %v4570_v13 = vld [vmem:[%s5870_s4 + $0x2f0] sm:$0xff]  }
 0x20f   : > { %4053 = vmatprep.subr.bf16.mxu0 %v4534_v16  ;;  %4071 = vmatprep.subr.bf16.mxu1 %v4535_v17  ;;  %v4397_v23 = vpop.f32.mrb[16].mxu1  ;;  %v4573_v16 = vld [vmem:[%s5870_s4 + $0x300] sm:$0xff]   ;;  %v4574_v17 = vld [vmem:[%s5870_s4 + $0x2f8] sm:$0xff]  }
 0x210   : > { %v5174_v24 = vpop.f32.mrb[17].mxu1 }
 0x211   : > { %v4398_v25 = vpop.f32.mrb[18].mxu1 }
 0x212   : > { %4054 = vmatpush3.bf16.msra.mxu0 %v4536_v19  ;;  %4072 = vmatpush3.bf16.msra.mxu1 %v4537_v20  ;;  %v831_v28 = vpack.c.bf16 %v4398_v25, %v4397_v23  ;;  %v5182_v29 = vpop.f32.mrb[19].mxu1  ;;  %v4576_v19 = vld [vmem:[%s5870_s4 + $0x2b8] sm:$0xff]   ;;  %v4577_v20 = vld [vmem:[%s5870_s4 + $0x308] sm:$0xff]   ;;  %v4580_v23 = vld [vmem:[%s5870_s4 + $0x310] sm:$0xff]  }
 0x213   : > { %4073 = vmatprep.subr.bf16.mxu1 %v4538_v21  ;;  %4083 = vmatprep.subr.bf16.mxu0 %v4539_v22  ;;  %v830_v32 = vpack.c.bf16 %v5182_v29, %v5174_v24  ;;  %v4578_v21 = vld [vmem:[%s5870_s4 + $0x350] sm:$0xff]   ;;  %v4579_v22 = vld [vmem:[%s5870_s4 + $0x3c0] sm:$0xff]   ;;  %v4582_v25 = vld [vmem:[%s5870_s4 + $0x358] sm:$0xff]  }
 0x214   : > { %v4581_v24 = vld [vmem:[%s5870_s4 + $0x380] sm:$0xff]  }
 0x215   : > { %1984 = vmatmul.mubr.bf16.vlgmr.msra.gmra.mrb[12].mxu0 %v826_v4  ;;  %v4564_v4 = vld [vmem:[%s5870_s4 + $0x230] sm:$0xff]   ;;  %v4586_v29 = vld [vmem:[%s5870_s4 + $0x360] sm:$0xff]  }
 0x216   : > { %4074 = vmatpush3.bf16.msra.mxu1 %v4540_v26  ;;  %4084 = vmatpush3.bf16.msra.mxu0 %v4541_v27  ;;  %v4583_v26 = vld [vmem:[%s5870_s4 + $0x3c8] sm:$0xff]   ;;  %v4584_v27 = vld [vmem:[%s5870_s4 + $0x318] sm:$0xff]  }
 0x217   : > { %4075 = vmatprep.subr.bf16.mxu1 %v4542_v30  ;;  %4085 = vmatprep.subr.bf16.mxu0 %v4543_v31  ;;  %v4401_v37 = vpop.f32.mrb[20].mxu1  ;;  %v4587_v30 = vld [vmem:[%s5870_s4 + $0x3d0] sm:$0xff]   ;;  %v4588_v31 = vld [vmem:[%s5870_s4 + $0x320] sm:$0xff]  }
 0x218   : > { %2065 = vmatprep.mubr.bf16.mxu0 %v831_v28  ;;  %v5204_v38 = vpop.f32.mrb[21].mxu1  ;;  %v4585_v28 = vld [vmem:[%s5870_s4 + $0x388] sm:$0xff]  }
 0x219   : > { %v4402_v39 = vpop.f32.mrb[22].mxu1 }
 0x21a   : > { %4076 = vmatpush3.bf16.msra.mxu1 %v4544_v33  ;;  %4086 = vmatpush3.bf16.msra.mxu0 %v4545_v34  ;;  %v833_v42 = vpack.c.bf16 %v4402_v39, %v4401_v37  ;;  %v5212_v43 = vpop.f32.mrb[23].mxu1  ;;  %v4590_v33 = vld [vmem:[%s5870_s4 + $0x368] sm:$0xff]   ;;  %v4591_v34 = vld [vmem:[%s5870_s4 + $0x3d8] sm:$0xff]   ;;  %v4594_v37 = vld [vmem:[%s5870_s4 + $0x370] sm:$0xff]  }
 0x21b   : > { %4087 = vmatprep.subr.bf16.mxu0 %v4546_v35  ;;  %4105 = vmatprep.subr.bf16.mxu1 %v4547_v36  ;;  %v832_v46 = vpack.c.bf16 %v5212_v43, %v5204_v38  ;;  %v4592_v35 = vld [vmem:[%s5870_s4 + $0x328] sm:$0xff]   ;;  %v4593_v36 = vld [vmem:[%s5870_s4 + $0x398] sm:$0xff]   ;;  %v4595_v38 = vld [vmem:[%s5870_s4 + $0x3e0] sm:$0xff]  }
 0x21c   : > { %v4596_v39 = vld [vmem:[%s5870_s4 + $0x330] sm:$0xff]   ;;  %v4600_v43 = vld [vmem:[%s5870_s4 + $0x338] sm:$0xff]  }
 0x21d   : > { %2025 = vmatmul.mubr.bf16.vlgmr.msra.gmra.mrb[36].mxu1 %v828_v18  ;;  %v4575_v18 = vld [vmem:[%s5870_s4 + $0x348] sm:$0xff]  }
 0x21e   : > { %4088 = vmatpush3.bf16.msra.mxu0 %v4548_v40  ;;  %4106 = vmatpush3.bf16.msra.mxu1 %v4549_v41  ;;  %v4597_v40 = vld [vmem:[%s5870_s4 + $0x3a0] sm:$0xff]   ;;  %v4598_v41 = vld [vmem:[%s5870_s4 + $0x378] sm:$0xff]  }
 0x21f   : > { %4089 = vmatprep.subr.bf16.mxu0 %v4550_v44  ;;  %4107 = vmatprep.subr.bf16.mxu1 %v4551_v45  ;;  %v4405_v51 = vpop.f32.mrb[24].mxu1  ;;  %v4601_v44 = vld [vmem:[%s5870_s4 + $0x3a8] sm:$0xff]   ;;  %v4602_v45 = vld [vmem:[%s5870_s4 + $0x3f0] sm:$0xff]  }
 0x220   : > { %2106 = vmatprep.mubr.bf16.mxu1 %v833_v42  ;;  %v5234_v52 = vpop.f32.mrb[25].mxu1  ;;  %v4599_v42 = vld [vmem:[%s5870_s4 + $0x3e8] sm:$0xff]  }
 0x221   : > { %v4406_v53 = vpop.f32.mrb[26].mxu1 }
 0x222   : > { %4090 = vmatpush3.bf16.msra.mxu0 %v4552_v47  ;;  %4108 = vmatpush3.bf16.msra.mxu1 %v4553_v48  ;;  %v835_v56 = vpack.c.bf16 %v4406_v53, %v4405_v51  ;;  %v5242_v57 = vpop.f32.mrb[27].mxu1  ;;  %v4604_v47 = vld [vmem:[%s5870_s4 + $0x3f8] sm:$0xff]   ;;  %v4608_v51 = vld [vmem:[%s5872_s6 + $0xc0] sm:$0xff]   ;;  %v4610_v53 = vld [vmem:[%s5872_s6 + $0x48] sm:$0xff]  }
 0x223   : > { %4091 = vmatprep.subr.bf16.mxu0 %v4554_v49  ;;  %4109 = vmatprep.subr.bf16.mxu1 %v4555_v50  ;;  %v834_v60 = vpack.c.bf16 %v5242_v57, %v5234_v52  ;;  %v4605_v48 = vld [vmem:[%s5870_s4 + $0x3b8] sm:$0xff]   ;;  %v4606_v49 = vld [vmem:[%s5872_s6 + $0x40] sm:$0xff]   ;;  %v4614_v57 = vld [vmem:[%s5872_s6 + $0x50] sm:$0xff]  }
 0x224   : > { %v4607_v50 = vld [vmem:[%s5872_s6] sm:$0xff]  }
 0x225   : > { %v4609_v52 = vld [vmem:[%s5872_s6 + $0x80] sm:$0xff]  }
 0x226   : > { %4092 = vmatpush3.bf16.msra.mxu0 %v4556_v54  ;;  %4110 = vmatpush3.bf16.msra.mxu1 %v4557_v55  ;;  %v4612_v54 = vld [vmem:[%s5872_s6 + $0xc8] sm:$0xff]  }
 0x227   : > { %4093 = vmatprep.subr.bf16.mxu0 %v4558_v58  ;;  %4111 = vmatprep.subr.bf16.mxu1 %v4559_v59  ;;  %v4409_v1 = vpop.f32.mrb[28].mxu1  ;;  %v4611_v55 = vld [vmem:[%s5872_s6 + $0x8] sm:$0xff]   ;;  %v4615_v58 = vld [vmem:[%s5872_s6 + $0x10] sm:$0xff]  }
 0x228   : > { %v5264_v2 = vpop.f32.mrb[29].mxu1  ;;  %v4616_v59 = vld [vmem:[%s5872_s6 + $0xd0] sm:$0xff]  }
 0x229   : > { %v4410_v3 = vpop.f32.mrb[30].mxu1 }
 0x22a   : > { %4094 = vmatpush3.bf16.msra.mxu0 %v4560_v61  ;;  %4112 = vmatpush3.bf16.msra.mxu1 %v4561_v62  ;;  %v837_v6 = vpack.c.bf16 %v4410_v3, %v4409_v1  ;;  %v5272_v7 = vpop.f32.mrb[31].mxu1  ;;  %v4618_v61 = vld [vmem:[%s5872_s6 + $0x58] sm:$0xff]   ;;  %v4622_v1 = vld [vmem:[%s5872_s6 + $0x60] sm:$0xff]  }
 0x22b   : > { %4095 = vmatprep.subr.bf16.mxu0 %v4562_v63  ;;  %4113 = vmatprep.subr.bf16.mxu1 %v4563_v0  ;;  %v836_v10 = vpack.c.bf16 %v5272_v7, %v5264_v2  ;;  %v4619_v62 = vld [vmem:[%s5872_s6 + $0x18] sm:$0xff]   ;;  %v4623_v2 = vld [vmem:[%s5872_s6 + $0x20] sm:$0xff]   ;;  %v4628_v7 = vld [vmem:[%s5872_s6 + $0xe8] sm:$0xff]  }
 0x22c   : > { %v4620_v63 = vld [vmem:[%s5872_s6 + $0xd8] sm:$0xff]   ;;  %v4624_v3 = vld [vmem:[%s5872_s6 + $0xe0] sm:$0xff]  }
 0x22d   : > { %v4621_v0 = vld [vmem:[%s5872_s6 + $0x98] sm:$0xff]  }
 0x22e   : > { %4096 = vmatpush3.bf16.msra.mxu0 %v4564_v4  ;;  %4114 = vmatpush3.bf16.msra.mxu1 %v4565_v5  ;;  %v4625_v4 = vld [vmem:[%s5872_s6 + $0xa0] sm:$0xff]   ;;  %v4626_v5 = vld [vmem:[%s5872_s6 + $0x68] sm:$0xff]  }
 0x22f   : > { %4097 = vmatprep.subr.bf16.mxu0 %v4566_v8  ;;  %4115 = vmatprep.subr.bf16.mxu1 %v4567_v9  ;;  %v4629_v8 = vld [vmem:[%s5872_s6 + $0xa8] sm:$0xff]   ;;  %v4630_v9 = vld [vmem:[%s5872_s6 + $0x70] sm:$0xff]  }
 0x232   : > { %4098 = vmatpush3.bf16.msra.mxu0 %v4568_v11  ;;  %4116 = vmatpush3.bf16.msra.mxu1 %v4569_v12  ;;  %v4632_v11 = vld [vmem:[%s5872_s6 + $0xf0] sm:$0xff]  }
 0x233   : > { %4117 = vmatprep.subr.bf16.mxu1 %v4570_v13  ;;  %4127 = vmatprep.subr.bf16.mxu0 %v4571_v14  ;;  %v4633_v12 = vld [vmem:[%s5872_s6 + $0xb0] sm:$0xff]   ;;  %v4634_v13 = vld [vmem:[%s5872_s6 + $0x78] sm:$0xff]  }
 0x234   : > { %v4635_v14 = vld [vmem:[%s5872_s6 + $0x38] sm:$0xff]  }
 0x235   : > { %2066 = vmatmul.mubr.bf16.vlgmr.msra.gmra.mrb[16].mxu0 %v830_v32  ;;  %v4589_v32 = vld [vmem:[%s5870_s4 + $0x390] sm:$0xff]  }
 0x236   : > { %4118 = vmatpush3.bf16.msra.mxu1 %v4572_v15  ;;  %4128 = vmatpush3.bf16.msra.mxu0 %v4573_v16  ;;  %v4636_v15 = vld [vmem:[%s5872_s6 + $0xf8] sm:$0xff]  }
 0x237   : > { %4119 = vmatprep.subr.bf16.mxu1 %v4574_v17  ;;  %4129 = vmatprep.subr.bf16.mxu0 %v4575_v18  ;;  %v4637_v16 = vld [vmem:[%s5872_s6 + $0xb8] sm:$0xff]   ;;  %v4638_v17 = vld [vmem:[%s5872_s6 + $0x140] sm:$0xff]  }
 0x238   : > { %2147 = vmatprep.mubr.bf16.mxu0 %v835_v56  ;;  %v4613_v56 = vld [vmem:[%s5872_s6 + $0x88] sm:$0xff]   ;;  %v4640_v18 = vld [vmem:[%s5872_s6 + $0x1c0] sm:$0xff]  }
 0x23a   : > { %4120 = vmatpush3.bf16.msra.mxu1 %v4576_v19  ;;  %4130 = vmatpush3.bf16.msra.mxu0 %v4577_v20 }
 0x23b   : > { %4131 = vmatprep.subr.bf16.mxu0 %v4578_v21  ;;  %4149 = vmatprep.subr.bf16.mxu1 %v4579_v22 }
 0x23d   : > { %2107 = vmatmul.mubr.bf16.vlgmr.msra.gmra.mrb[40].mxu1 %v832_v46  ;;  %v4603_v46 = vld [vmem:[%s5870_s4 + $0x3b0] sm:$0xff]  }
 0x23e   : > { %4132 = vmatpush3.bf16.msra.mxu0 %v4580_v23  ;;  %4150 = vmatpush3.bf16.msra.mxu1 %v4581_v24 }
 0x23f   : > { %4133 = vmatprep.subr.bf16.mxu0 %v4582_v25  ;;  %4151 = vmatprep.subr.bf16.mxu1 %v4583_v26  ;;  %v3702_v25 = vld [vmem:[%s5871_s5] ss:$0 sm:$0xff] }
 0x240   : > { %2188 = vmatprep.mubr.bf16.mxu1 %v837_v6  ;;  %v4627_v6 = vld [vmem:[%s5872_s6 + $0x28] sm:$0xff]  }
 0x242   : > { %4134 = vmatpush3.bf16.msra.mxu0 %v4584_v27  ;;  %4152 = vmatpush3.bf16.msra.mxu1 %v4585_v28 }
 0x243   : > { %4135 = vmatprep.subr.bf16.mxu0 %v4586_v29  ;;  %4153 = vmatprep.subr.bf16.mxu1 %v4587_v30 }
 0x246   : > { %4136 = vmatpush3.bf16.msra.mxu0 %v4588_v31  ;;  %4154 = vmatpush3.bf16.msra.mxu1 %v4589_v32 }
 0x247   : > { %4137 = vmatprep.subr.bf16.mxu0 %v4590_v33  ;;  %4155 = vmatprep.subr.bf16.mxu1 %v4591_v34 }
 0x24a   : > { %4138 = vmatpush3.bf16.msra.mxu0 %v4592_v35  ;;  %4156 = vmatpush3.bf16.msra.mxu1 %v4593_v36 }
 0x24b   : > { %4139 = vmatprep.subr.bf16.mxu0 %v4594_v37  ;;  %4157 = vmatprep.subr.bf16.mxu1 %v4595_v38 }
 0x24e   : > { %4140 = vmatpush3.bf16.msra.mxu0 %v4596_v39  ;;  %4158 = vmatpush3.bf16.msra.mxu1 %v4597_v40 }
 0x24f   : > { %4141 = vmatprep.subr.bf16.mxu0 %v4598_v41  ;;  %4159 = vmatprep.subr.bf16.mxu1 %v4599_v42 }
 0x252   : > { %4142 = vmatpush3.bf16.msra.mxu0 %v4600_v43  ;;  %4160 = vmatpush3.bf16.msra.mxu1 %v4601_v44 }
 0x253   : > { %4161 = vmatprep.subr.bf16.mxu1 %v4602_v45  ;;  %4171 = vmatprep.subr.bf16.mxu0 %v4606_v49 }
 0x255   : > { %2148 = vmatmul.mubr.bf16.vlgmr.msra.gmra.mrb[20].mxu0 %v834_v60  ;;  %v4617_v60 = vld [vmem:[%s5872_s6 + $0x90] sm:$0xff]  }
 0x256   : > { %4162 = vmatpush3.bf16.msra.mxu1 %v4603_v46  ;;  %4172 = vmatpush3.bf16.msra.mxu0 %v4607_v50 }
 0x257   : > { %4163 = vmatprep.subr.bf16.mxu1 %v4604_v47  ;;  %4173 = vmatprep.subr.bf16.mxu0 %v4610_v53 }
 0x25a   : > { %4164 = vmatpush3.bf16.msra.mxu1 %v4605_v48  ;;  %4174 = vmatpush3.bf16.msra.mxu0 %v4611_v55 }
 0x25b   : > { %4193 = vmatprep.subr.bf16.mxu1 %v4608_v51  ;;  %4175 = vmatprep.subr.bf16.mxu0 %v4614_v57 }
 0x25d   : > { %2189 = vmatmul.mubr.bf16.vlgmr.msra.gmra.mrb[44].mxu1 %v836_v10  ;;  %v4631_v10 = vld [vmem:[%s5872_s6 + $0x30] sm:$0xff]  }
 0x25e   : > { %4194 = vmatpush3.bf16.msra.mxu1 %v4609_v52  ;;  %4176 = vmatpush3.bf16.msra.mxu0 %v4615_v58 }
 0x25f   : > { %4195 = vmatprep.subr.bf16.mxu1 %v4612_v54  ;;  %4177 = vmatprep.subr.bf16.mxu0 %v4618_v61 }
 0x262   : > { %4196 = vmatpush3.bf16.msra.mxu1 %v4613_v56  ;;  %4178 = vmatpush3.bf16.msra.mxu0 %v4619_v62 }
 0x263   : > { %4197 = vmatprep.subr.bf16.mxu1 %v4616_v59  ;;  %4179 = vmatprep.subr.bf16.mxu0 %v4622_v1 }
 0x266   : > { %4198 = vmatpush3.bf16.msra.mxu1 %v4617_v60  ;;  %4180 = vmatpush3.bf16.msra.mxu0 %v4623_v2 }
 0x267   : > { %4199 = vmatprep.subr.bf16.mxu1 %v4620_v63  ;;  %4181 = vmatprep.subr.bf16.mxu0 %v4626_v5 }
 0x26a   : > { %4200 = vmatpush3.bf16.msra.mxu1 %v4621_v0  ;;  %4182 = vmatpush3.bf16.msra.mxu0 %v4627_v6 }
 0x26b   : > { %4201 = vmatprep.subr.bf16.mxu1 %v4624_v3  ;;  %4183 = vmatprep.subr.bf16.mxu0 %v4630_v9 }
 0x26e   : > { %4202 = vmatpush3.bf16.msra.mxu1 %v4625_v4  ;;  %4184 = vmatpush3.bf16.msra.mxu0 %v4631_v10 }
 0x26f   : > { %4203 = vmatprep.subr.bf16.mxu1 %v4628_v7  ;;  %4185 = vmatprep.subr.bf16.mxu0 %v4634_v13 }
 0x272   : > { %4204 = vmatpush3.bf16.msra.mxu1 %v4629_v8  ;;  %4186 = vmatpush3.bf16.msra.mxu0 %v4635_v14 }
 0x273   : > { %4205 = vmatprep.subr.bf16.mxu1 %v4632_v11  ;;  %4215 = vmatprep.subr.bf16.mxu0 %v4638_v17 }
 0x276   : > { %4206 = vmatpush3.bf16.msra.mxu1 %v4633_v12 }
 0x277   : > { %4207 = vmatprep.subr.bf16.mxu1 %v4636_v15 }
 0x27a   : > { %4208 = vmatpush3.bf16.msra.mxu1 %v4637_v16 }
 0x27b   : > { %4237 = vmatprep.subr.bf16.mxu1 %v4640_v18 }
 0x2c8   : > { %v4011_v19 = vpop.f32.mrb[8].mxu0 }
 0x2c9   : > { %v4012_v20 = vpop.f32.mrb[9].mxu0 }
 0x2ca   : > { %v4013_v21 = vadd.f32 %v4012_v20, %v4011_v19  ;;  %v4014_v22 = vpop.f32.mrb[10].mxu0 }
 0x2cb   : > { %v4015_v23 = vpop.f32.mrb[11].mxu0 }
 0x2cc   : > { %v4016_v24 = vadd.f32 %v4015_v23, %v4014_v22  ;;  %v1904_v28 = vadd.f32 %v4013_v21, %v3702_v25 }
 0x2ce   : > { %v1907_v32 = vadd.f32 %v4016_v24, %v3702_v25 }
 0x2d0   : > { %v4033_v26 = vpop.f32.mrb[32].mxu1 }
 0x2d1   : > { %v4034_v27 = vpop.f32.mrb[33].mxu1 }
 0x2d2   : > { %v4035_v29 = vadd.f32 %v4034_v27, %v4033_v26  ;;  %v4036_v30 = vpop.f32.mrb[34].mxu1  ;;  %v4639_v26 = vld [vmem:[%s5872_s6 + $0x100] sm:$0xff]  }
 0x2d3   : > { %v4037_v31 = vpop.f32.mrb[35].mxu1 }
 0x2d4   : > { %v1945_v33 = vadd.f32 %v4035_v29, %v1904_v28  ;;  %v4038_v34 = vadd.f32 %v4037_v31, %v4036_v30  ;;  %v4641_v29 = vld [vmem:[%s5872_s6 + $0x180] sm:$0xff]   ;;  %v4642_v30 = vld [vmem:[%s5872_s6 + $0x148] sm:$0xff]  }
 0x2d6   : > { %v1948_v35 = vadd.f32 %v4038_v34, %v1907_v32  ;;  %v4644_v32 = vld [vmem:[%s5872_s6 + $0x1c8] sm:$0xff]  }
 0x2e8   : > { %v4055_v36 = vpop.f32.mrb[12].mxu0 }
 0x2e9   : > { %v4056_v37 = vpop.f32.mrb[13].mxu0 }
 0x2ea   : > { %v4057_v38 = vadd.f32 %v4056_v37, %v4055_v36  ;;  %v4058_v39 = vpop.f32.mrb[14].mxu0  ;;  %v4645_v36 = vld [vmem:[%s5872_s6 + $0x188] sm:$0xff]   ;;  %v4648_v37 = vld [vmem:[%s5872_s6 + $0x1d0] sm:$0xff]  }
 0x2eb   : > { %v4059_v40 = vpop.f32.mrb[15].mxu0 }
 0x2ec   : > { %v1986_v41 = vadd.f32 %v4057_v38, %v1945_v33  ;;  %v4060_v42 = vadd.f32 %v4059_v40, %v4058_v39  ;;  %v4643_v33 = vld [vmem:[%s5872_s6 + $0x108] sm:$0xff]   ;;  %v4647_v38 = vld [vmem:[%s5872_s6 + $0x110] sm:$0xff]   ;;  %v4650_v39 = vld [vmem:[%s5872_s6 + $0x158] sm:$0xff]  }
 0x2ed   : > { %v4649_v40 = vld [vmem:[%s5872_s6 + $0x190] sm:$0xff]  }
 0x2ee   : > { %v1989_v43 = vadd.f32 %v4060_v42, %v1948_v35  ;;  %v4646_v35 = vld [vmem:[%s5872_s6 + $0x150] sm:$0xff]   ;;  %v4651_v42 = vld [vmem:[%s5872_s6 + $0x118] sm:$0xff]  }
 0x2f0   : > { %v4077_v44 = vpop.f32.mrb[36].mxu1 }
 0x2f1   : > { %v4078_v45 = vpop.f32.mrb[37].mxu1 }
 0x2f2   : > { %v4079_v46 = vadd.f32 %v4078_v45, %v4077_v44  ;;  %v4080_v47 = vpop.f32.mrb[38].mxu1  ;;  %v4653_v44 = vld [vmem:[%s5872_s6 + $0x198] sm:$0xff]   ;;  %v4656_v45 = vld [vmem:[%s5872_s6 + $0x1e0] sm:$0xff]  }
 0x2f3   : > { %v4081_v48 = vpop.f32.mrb[39].mxu1 }
 0x2f4   : > { %v2027_v49 = vadd.f32 %v4079_v46, %v1986_v41  ;;  %v4082_v50 = vadd.f32 %v4081_v48, %v4080_v47  ;;  %v4652_v41 = vld [vmem:[%s5872_s6 + $0x1d8] sm:$0xff]   ;;  %v4655_v46 = vld [vmem:[%s5872_s6 + $0x120] sm:$0xff]   ;;  %v4658_v47 = vld [vmem:[%s5872_s6 + $0x168] sm:$0xff]  }
 0x2f5   : > { %v4657_v48 = vld [vmem:[%s5872_s6 + $0x1a0] sm:$0xff]  }
 0x2f6   : > { %v2030_v51 = vadd.f32 %v4082_v50, %v1989_v43  ;;  %v4654_v43 = vld [vmem:[%s5872_s6 + $0x160] sm:$0xff]   ;;  %v4659_v50 = vld [vmem:[%s5872_s6 + $0x128] sm:$0xff]  }
 0x308   : > { %v4099_v52 = vpop.f32.mrb[16].mxu0 }
 0x309   : > { %v4100_v53 = vpop.f32.mrb[17].mxu0 }
 0x30a   : > { %v4101_v54 = vadd.f32 %v4100_v53, %v4099_v52  ;;  %v4102_v55 = vpop.f32.mrb[18].mxu0  ;;  %v4661_v52 = vld [vmem:[%s5872_s6 + $0x1a8] sm:$0xff]   ;;  %v4664_v53 = vld [vmem:[%s5872_s6 + $0x1f0] sm:$0xff]  }
 0x30b   : > { %v4103_v56 = vpop.f32.mrb[19].mxu0 }
 0x30c   : > { %v2068_v57 = vadd.f32 %v4101_v54, %v2027_v49  ;;  %v4104_v58 = vadd.f32 %v4103_v56, %v4102_v55  ;;  %v4660_v49 = vld [vmem:[%s5872_s6 + $0x1e8] sm:$0xff]   ;;  %v4663_v54 = vld [vmem:[%s5872_s6 + $0x130] sm:$0xff]   ;;  %v4666_v55 = vld [vmem:[%s5872_s6 + $0x178] sm:$0xff]  }
 0x30d   : > { %v4665_v56 = vld [vmem:[%s5872_s6 + $0x1b0] sm:$0xff]  }
 0x30e   : > { %v2071_v59 = vadd.f32 %v4104_v58, %v2030_v51  ;;  %v4662_v51 = vld [vmem:[%s5872_s6 + $0x170] sm:$0xff]   ;;  %v4667_v58 = vld [vmem:[%s5872_s6 + $0x138] sm:$0xff]  }
 0x310   : > { %v4121_v60 = vpop.f32.mrb[40].mxu1 }
 0x311   : > { %v4122_v61 = vpop.f32.mrb[41].mxu1 }
 0x312   : > { %v4123_v62 = vadd.f32 %v4122_v61, %v4121_v60  ;;  %v4124_v63 = vpop.f32.mrb[42].mxu1  ;;  %v4669_v60 = vld [vmem:[%s5872_s6 + $0x1b8] sm:$0xff]   ;;  %v4672_v61 = vld [vmem:[%s5872_s6 + $0x2c0] sm:$0xff]  }
 0x313   : > { %v4125_v0 = vpop.f32.mrb[43].mxu1 }
 0x314   : > { %v2109_v1 = vadd.f32 %v4123_v62, %v2068_v57  ;;  %v4126_v2 = vadd.f32 %v4125_v0, %v4124_v63  ;;  %v4668_v57 = vld [vmem:[%s5872_s6 + $0x1f8] sm:$0xff]   ;;  %v4671_v62 = vld [vmem:[%s5872_s6 + $0x200] sm:$0xff]   ;;  %v4674_v0 = vld [vmem:[%s5872_s6 + $0x248] sm:$0xff]  }
 0x316   : > { %v2112_v3 = vadd.f32 %v4126_v2, %v2071_v59  ;;  %v4670_v59 = vld [vmem:[%s5872_s6 + $0x240] sm:$0xff]  }
 0x317   : > { %v4673_v2 = vld [vmem:[%s5872_s6 + $0x280] sm:$0xff]  }
 0x328   : > { %v4143_v4 = vpop.f32.mrb[20].mxu0 }
 0x329   : > { %v4144_v5 = vpop.f32.mrb[21].mxu0 }
 0x32a   : > { %v4145_v6 = vadd.f32 %v4144_v5, %v4143_v4  ;;  %v4146_v7 = vpop.f32.mrb[22].mxu0  ;;  %v4676_v4 = vld [vmem:[%s5872_s6 + $0x2c8] sm:$0xff]  }
 0x32b   : > { %v4147_v8 = vpop.f32.mrb[23].mxu0 }
 0x32c   : > { %v2150_v9 = vadd.f32 %v4145_v6, %v2109_v1  ;;  %v4148_v10 = vadd.f32 %v4147_v8, %v4146_v7  ;;  %v4675_v6 = vld [vmem:[%s5872_s6 + $0x208] sm:$0xff]   ;;  %v4678_v7 = vld [vmem:[%s5872_s6 + $0x250] sm:$0xff]  }
 0x32d   : > { %v4677_v8 = vld [vmem:[%s5872_s6 + $0x288] sm:$0xff]  }
 0x32e   : > { %v2153_v11 = vadd.f32 %v4148_v10, %v2112_v3  ;;  %v4679_v10 = vld [vmem:[%s5872_s6 + $0x210] sm:$0xff]  }
 0x330   : > { %v4165_v12 = vpop.f32.mrb[44].mxu1 }
 0x331   : > { %v4166_v13 = vpop.f32.mrb[45].mxu1 }
 0x332   : > { %v4167_v14 = vadd.f32 %v4166_v13, %v4165_v12  ;;  %v4168_v15 = vpop.f32.mrb[46].mxu1  ;;  %v4681_v12 = vld [vmem:[%s5872_s6 + $0x290] sm:$0xff]   ;;  %v4684_v13 = vld [vmem:[%s5872_s6 + $0x2d8] sm:$0xff]  }
 0x333   : > { %v4169_v16 = vpop.f32.mrb[47].mxu1 }
 0x334   : > { %v2191_v17 = vadd.f32 %v4167_v14, %v2150_v9  ;;  %v4170_v18 = vadd.f32 %v4169_v16, %v4168_v15  ;;  %v4680_v9 = vld [vmem:[%s5872_s6 + $0x2d0] sm:$0xff]   ;;  %v4683_v14 = vld [vmem:[%s5872_s6 + $0x218] sm:$0xff]   ;;  %v4686_v15 = vld [vmem:[%s5872_s6 + $0x260] sm:$0xff]  }
 0x335   : > { %v4685_v16 = vld [vmem:[%s5872_s6 + $0x298] sm:$0xff]  }
 0x336   : > { %v2199_v19 = vmul.f32 0.2, %v2191_v17  ;;  %v2194_v20 = vadd.f32 %v4170_v18, %v2153_v11  ;;  %vm2197_vm9 = vcmp.gt.f32.partialorder %v2191_v17, 0.0  ;;  %v4682_v11 = vld [vmem:[%s5872_s6 + $0x258] sm:$0xff]   ;;  %v4687_v18 = vld [vmem:[%s5872_s6 + $0x220] sm:$0xff]  }
 0x338   : > { %vm2198_vm10 = vcmp.gt.f32.partialorder %v2194_v20, 0.0  ;;  %v2200_v21 = vmul.f32 0.2, %v2194_v20  ;;  %v2201_v22 = vsel %vm2197_vm9, %v2191_v17, %v2199_v19  ;;  %v4688_v17 = vld [vmem:[%s5872_s6 + $0x2e0] sm:$0xff]   ;;  %v4690_v19 = vld [vmem:[%s5872_s6 + $0x268] sm:$0xff]  }
 0x33a   : > { %v2202_v23 = vsel %vm2198_vm10, %v2194_v20, %v2200_v21  ;;  %v4689_v20 = vld [vmem:[%s5872_s6 + $0x2a0] sm:$0xff]   ;;  %v4692_v21 = vld [vmem:[%s5872_s6 + $0x2e8] sm:$0xff]  }
 0x33b   : > { %v5513_v24 = vpack.c.bf16 %v2202_v23, %v2201_v22  ;;  %v4691_v22 = vld [vmem:[%s5872_s6 + $0x228] sm:$0xff]   ;;  %v4694_v23 = vld [vmem:[%s5872_s6 + $0x270] sm:$0xff]  }
 0x33d   : > { %v5516_v25 = vshrl.u32 %v5513_v24, 16  ;;  %v2209_v31 = vrot.slane %v5513_v24, 1  ;;  %v2213_v63 = vrot.slane %v5513_v24, 2  ;;  %v2217_v3 = vrot.slane %v5513_v24, 3 }
 0x33f   : > { %3294 = vmatprep.mubr.bf16.mxu0 %v5516_v25  ;;  %v2211_v27 = vrot.slane %v5516_v25, 1  ;;  %v2215_v28 = vrot.slane %v5516_v25, 2  ;;  %v2219_v34 = vrot.slane %v5516_v25, 3  ;;  %v2223_v1 = vrot.slane %v5516_v25, 4 }
 0x340   : > { %3295 = vmatmul.mubr.bf16.vlgmr.msra.gmra.mrb[24].mxu0 %v5513_v24  ;;  %v2227_v5 = vrot.slane %v5516_v25, 5 }
 0x341   : > { %4216 = vmatpush3.bf16.msra.mxu0 %v4639_v26  ;;  %3334 = vmatprep.mubr.bf16.mxu1 %v2211_v27  ;;  %v4693_v26 = vld [vmem:[%s5872_s6 + $0x2a8] sm:$0xff]   ;;  %v4696_v27 = vld [vmem:[%s5872_s6 + $0x2f0] sm:$0xff]  }
 0x342   : > { %3374 = vmatprep.mubr.bf16.mxu0 %v2215_v28  ;;  %3335 = vmatmul.mubr.bf16.vlgmr.msra.gmra.mrb[48].mxu1 %v2209_v31  ;;  %v4695_v28 = vld [vmem:[%s5872_s6 + $0x230] sm:$0xff]   ;;  %v4700_v31 = vld [vmem:[%s5872_s6 + $0x2f8] sm:$0xff]  }
 0x343   : > { %4238 = vmatpush3.bf16.msra.mxu1 %v4641_v29  ;;  %4217 = vmatprep.subr.bf16.mxu0 %v4642_v30  ;;  %v4698_v29 = vld [vmem:[%s5872_s6 + $0x278] sm:$0xff]   ;;  %v4697_v30 = vld [vmem:[%s5872_s6 + $0x2b0] sm:$0xff]  }
 0x344   : > { %3414 = vmatprep.mubr.bf16.mxu1 %v2219_v34  ;;  %4239 = vmatprep.subr.bf16.mxu1 %v4644_v32  ;;  %v4699_v32 = vld [vmem:[%s5872_s6 + $0x238] sm:$0xff]  }
 0x345   : > { %4218 = vmatpush3.bf16.msra.mxu0 %v4643_v33  ;;  %v4702_v33 = vld [vmem:[%s5872_s6 + $0x340] sm:$0xff]   ;;  %v4701_v34 = vld [vmem:[%s5872_s6 + $0x2b8] sm:$0xff]  }
 0x346   : > { %4219 = vmatprep.subr.bf16.mxu0 %v4646_v35  ;;  %v4704_v35 = vld [vmem:[%s5872_s6 + $0x3c0] sm:$0xff]  }
 0x347   : > { %4240 = vmatpush3.bf16.msra.mxu1 %v4645_v36  ;;  %v4703_v36 = vld [vmem:[%s5872_s6 + $0x300] sm:$0xff]  }
 0x348   : > { %4241 = vmatprep.subr.bf16.mxu1 %v4648_v37  ;;  %v2221_v37 = vrot.slane %v5513_v24, 4 }
 0x349   : > { %4220 = vmatpush3.bf16.msra.mxu0 %v4647_v38  ;;  %v4706_v38 = vld [vmem:[%s5872_s6 + $0x348] sm:$0xff]  }
 0x34a   : > { %4221 = vmatprep.subr.bf16.mxu0 %v4650_v39  ;;  %v2231_v39 = vrot.slane %v5516_v25, 6 }
 0x34b   : > { %4242 = vmatpush3.bf16.msra.mxu1 %v4649_v40  ;;  %v4705_v40 = vld [vmem:[%s5872_s6 + $0x380] sm:$0xff]  }
 0x34c   : > { %4243 = vmatprep.subr.bf16.mxu1 %v4652_v41  ;;  %v2225_v41 = vrot.slane %v5513_v24, 5 }
 0x34d   : > { %4222 = vmatpush3.bf16.msra.mxu0 %v4651_v42  ;;  %v4708_v42 = vld [vmem:[%s5872_s6 + $0x3c8] sm:$0xff]  }
 0x34e   : > { %4223 = vmatprep.subr.bf16.mxu0 %v4654_v43  ;;  %v2235_v43 = vrot.slane %v5516_v25, 7  ;;  %v4712_v25 = vld [vmem:[%s5872_s6 + $0x3d0] sm:$0xff]  }
 0x34f   : > { %4244 = vmatpush3.bf16.msra.mxu1 %v4653_v44  ;;  %v4707_v44 = vld [vmem:[%s5872_s6 + $0x308] sm:$0xff]  }
 0x350   : > { %4245 = vmatprep.subr.bf16.mxu1 %v4656_v45  ;;  %v4710_v45 = vld [vmem:[%s5872_s6 + $0x350] sm:$0xff]  }
 0x351   : > { %4224 = vmatpush3.bf16.msra.mxu0 %v4655_v46  ;;  %v4709_v46 = vld [vmem:[%s5872_s6 + $0x388] sm:$0xff]  }
 0x352   : > { %4225 = vmatprep.subr.bf16.mxu0 %v4658_v47  ;;  %v4711_v47 = vld [vmem:[%s5872_s6 + $0x310] sm:$0xff]  }
 0x353   : > { %4246 = vmatpush3.bf16.msra.mxu1 %v4657_v48  ;;  %v4714_v48 = vld [vmem:[%s5872_s6 + $0x358] sm:$0xff]  }
 0x354   : > { %4247 = vmatprep.subr.bf16.mxu1 %v4660_v49  ;;  %v4713_v49 = vld [vmem:[%s5872_s6 + $0x390] sm:$0xff]  }
 0x355   : > { %4226 = vmatpush3.bf16.msra.mxu0 %v4659_v50  ;;  %v4716_v50 = vld [vmem:[%s5872_s6 + $0x3d8] sm:$0xff]  }
 0x356   : > { %4227 = vmatprep.subr.bf16.mxu0 %v4662_v51  ;;  %v4715_v51 = vld [vmem:[%s5872_s6 + $0x318] sm:$0xff]  }
 0x357   : > { %4248 = vmatpush3.bf16.msra.mxu1 %v4661_v52  ;;  %v4718_v52 = vld [vmem:[%s5872_s6 + $0x360] sm:$0xff]  }
 0x358   : > { %4249 = vmatprep.subr.bf16.mxu1 %v4664_v53  ;;  %v4717_v53 = vld [vmem:[%s5872_s6 + $0x398] sm:$0xff]  }
 0x359   : > { %4228 = vmatpush3.bf16.msra.mxu0 %v4663_v54  ;;  %v4720_v54 = vld [vmem:[%s5872_s6 + $0x3e0] sm:$0xff]  }
 0x35a   : > { %4229 = vmatprep.subr.bf16.mxu0 %v4666_v55  ;;  %v4719_v55 = vld [vmem:[%s5872_s6 + $0x320] sm:$0xff]  }
 0x35b   : > { %4250 = vmatpush3.bf16.msra.mxu1 %v4665_v56  ;;  %v4722_v56 = vld [vmem:[%s5872_s6 + $0x368] sm:$0xff]  }
 0x35c   : > { %4251 = vmatprep.subr.bf16.mxu1 %v4668_v57  ;;  %v4721_v57 = vld [vmem:[%s5872_s6 + $0x3a0] sm:$0xff]  }
 0x35d   : > { %4230 = vmatpush3.bf16.msra.mxu0 %v4667_v58  ;;  %v4724_v58 = vld [vmem:[%s5872_s6 + $0x3e8] sm:$0xff]  }
 0x35e   : > { %4259 = vmatprep.subr.bf16.mxu0 %v4670_v59  ;;  %v4723_v59 = vld [vmem:[%s5872_s6 + $0x328] sm:$0xff]  }
 0x35f   : > { %4252 = vmatpush3.bf16.msra.mxu1 %v4669_v60  ;;  %v4726_v60 = vld [vmem:[%s5872_s6 + $0x370] sm:$0xff]  }
 0x360   : > { %3375 = vmatmul.mubr.bf16.vlgmr.msra.gmra.mrb[28].mxu0 %v2213_v63  ;;  %4281 = vmatprep.subr.bf16.mxu1 %v4672_v61  ;;  %v4725_v61 = vld [vmem:[%s5872_s6 + $0x3a8] sm:$0xff]   ;;  %v4727_v63 = vld [vmem:[%s5872_s6 + $0x330] sm:$0xff]  }
 0x361   : > { %4260 = vmatpush3.bf16.msra.mxu0 %v4671_v62  ;;  %3454 = vmatprep.mubr.bf16.mxu0 %v2223_v1  ;;  %v4728_v62 = vld [vmem:[%s5872_s6 + $0x3f0] sm:$0xff]  }
 0x362   : > { %3415 = vmatmul.mubr.bf16.vlgmr.msra.gmra.mrb[52].mxu1 %v2217_v3  ;;  %4261 = vmatprep.subr.bf16.mxu0 %v4674_v0  ;;  %v4730_v0 = vld [vmem:[%s5872_s6 + $0x378] sm:$0xff]   ;;  %v4729_v1 = vld [vmem:[%s5872_s6 + $0x3b0] sm:$0xff]  }
 0x363   : > { %4282 = vmatpush3.bf16.msra.mxu1 %v4673_v2  ;;  %3494 = vmatprep.mubr.bf16.mxu1 %v2227_v5  ;;  %v4732_v2 = vld [vmem:[%s5872_s6 + $0x3f8] sm:$0xff]   ;;  %v2229_v5 = vrot.slane %v5513_v24, 6 }
 0x364   : > { %4283 = vmatprep.subr.bf16.mxu1 %v4676_v4  ;;  %v4731_v3 = vld [vmem:[%s5872_s6 + $0x338] sm:$0xff]  }
 0x365   : > { %4262 = vmatpush3.bf16.msra.mxu0 %v4675_v6  ;;  %v4733_v4 = vld [vmem:[%s5872_s6 + $0x3b8] sm:$0xff]   ;;  %v2233_v6 = vrot.slane %v5513_v24, 7 }
 0x366   : > { %4263 = vmatprep.subr.bf16.mxu0 %v4678_v7 }
 0x367   : > { %4284 = vmatpush3.bf16.msra.mxu1 %v4677_v8  ;;  %v2493_v8 = vld [vmem:[%s5873_s7] sm:$0x1] }
 0x368   : > { %4285 = vmatprep.subr.bf16.mxu1 %v4680_v9 }
 0x369   : > { %4264 = vmatpush3.bf16.msra.mxu0 %v4679_v10 }
 0x36a   : > { %4265 = vmatprep.subr.bf16.mxu0 %v4682_v11 }
 0x36b   : > { %4286 = vmatpush3.bf16.msra.mxu1 %v4681_v12 }
 0x36c   : > { %4287 = vmatprep.subr.bf16.mxu1 %v4684_v13 }
 0x36d   : > { %4266 = vmatpush3.bf16.msra.mxu0 %v4683_v14 }
 0x36e   : > { %4267 = vmatprep.subr.bf16.mxu0 %v4686_v15 }
 0x36f   : > { %4288 = vmatpush3.bf16.msra.mxu1 %v4685_v16 }
 0x370   : > { %4289 = vmatprep.subr.bf16.mxu1 %v4688_v17 }
 0x371   : > { %4268 = vmatpush3.bf16.msra.mxu0 %v4687_v18 }
 0x372   : > { %4269 = vmatprep.subr.bf16.mxu0 %v4690_v19 }
 0x373   : > { %4290 = vmatpush3.bf16.msra.mxu1 %v4689_v20 }
 0x374   : > { %4291 = vmatprep.subr.bf16.mxu1 %v4692_v21 }
 0x375   : > { %4270 = vmatpush3.bf16.msra.mxu0 %v4691_v22 }
 0x376   : > { %4271 = vmatprep.subr.bf16.mxu0 %v4694_v23 }
 0x377   : > { %4292 = vmatpush3.bf16.msra.mxu1 %v4693_v26 }
 0x378   : > { %4293 = vmatprep.subr.bf16.mxu1 %v4696_v27 }
 0x379   : > { %4272 = vmatpush3.bf16.msra.mxu0 %v4695_v28 }
 0x37a   : > { %4273 = vmatprep.subr.bf16.mxu0 %v4698_v29 }
 0x37b   : > { %4294 = vmatpush3.bf16.msra.mxu1 %v4697_v30 }
 0x37c   : > { %4295 = vmatprep.subr.bf16.mxu1 %v4700_v31 }
 0x37d   : > { %4274 = vmatpush3.bf16.msra.mxu0 %v4699_v32 }
 0x37e   : > { %4303 = vmatprep.subr.bf16.mxu0 %v4702_v33 }
 0x37f   : > { %4296 = vmatpush3.bf16.msra.mxu1 %v4701_v34 }
 0x380   : > { %3455 = vmatmul.mubr.bf16.vlgmr.msra.gmra.mrb[32].mxu0 %v2221_v37  ;;  %4325 = vmatprep.subr.bf16.mxu1 %v4704_v35 }
 0x381   : > { %4304 = vmatpush3.bf16.msra.mxu0 %v4703_v36  ;;  %3534 = vmatprep.mubr.bf16.mxu0 %v2231_v39 }
 0x382   : > { %3495 = vmatmul.mubr.bf16.vlgmr.msra.gmra.mrb[56].mxu1 %v2225_v41  ;;  %4305 = vmatprep.subr.bf16.mxu0 %v4706_v38 }
 0x383   : > { %4326 = vmatpush3.bf16.msra.mxu1 %v4705_v40  ;;  %3574 = vmatprep.mubr.bf16.mxu1 %v2235_v43 }
 0x384   : > { %4327 = vmatprep.subr.bf16.mxu1 %v4708_v42 }
 0x385   : > { %4306 = vmatpush3.bf16.msra.mxu0 %v4707_v44 }
 0x386   : > { %4307 = vmatprep.subr.bf16.mxu0 %v4710_v45 }
 0x387   : > { %4328 = vmatpush3.bf16.msra.mxu1 %v4709_v46 }
 0x388   : > { %4329 = vmatprep.subr.bf16.mxu1 %v4712_v25 }
 0x389   : > { %4308 = vmatpush3.bf16.msra.mxu0 %v4711_v47 }
 0x38a   : > { %4309 = vmatprep.subr.bf16.mxu0 %v4714_v48 }
 0x38b   : > { %4330 = vmatpush3.bf16.msra.mxu1 %v4713_v49 }
 0x38c   : > { %4331 = vmatprep.subr.bf16.mxu1 %v4716_v50 }
 0x38d   : > { %4310 = vmatpush3.bf16.msra.mxu0 %v4715_v51 }
 0x38e   : > { %4311 = vmatprep.subr.bf16.mxu0 %v4718_v52 }
 0x38f   : > { %4332 = vmatpush3.bf16.msra.mxu1 %v4717_v53 }
 0x390   : > { %4333 = vmatprep.subr.bf16.mxu1 %v4720_v54 }
 0x391   : > { %4312 = vmatpush3.bf16.msra.mxu0 %v4719_v55 }
 0x392   : > { %4313 = vmatprep.subr.bf16.mxu0 %v4722_v56 }
 0x393   : > { %4334 = vmatpush3.bf16.msra.mxu1 %v4721_v57 }
 0x394   : > { %4335 = vmatprep.subr.bf16.mxu1 %v4724_v58 }
 0x395   : > { %4314 = vmatpush3.bf16.msra.mxu0 %v4723_v59 }
 0x396   : > { %4315 = vmatprep.subr.bf16.mxu0 %v4726_v60 }
 0x397   : > { %4336 = vmatpush3.bf16.msra.mxu1 %v4725_v61 }
 0x398   : > { %4337 = vmatprep.subr.bf16.mxu1 %v4728_v62 }
 0x399   : > { %4316 = vmatpush3.bf16.msra.mxu0 %v4727_v63 }
 0x39a   : > { %4317 = vmatprep.subr.bf16.mxu0 %v4730_v0 }
 0x39b   : > { %4338 = vmatpush3.bf16.msra.mxu1 %v4729_v1 }
 0x39c   : > { %4339 = vmatprep.subr.bf16.mxu1 %v4732_v2 }
 0x39d   : > { %4318 = vmatpush3.bf16.msra.mxu0 %v4731_v3 }
 0x39f   : > { %4340 = vmatpush3.bf16.msra.mxu1 %v4733_v4 }
 0x3a0   : > { %3535 = vmatmul.mubr.bf16.vlgmr.msra.gmra.mrb[36].mxu0 %v2229_v5 }
 0x3a2   : > { %3575 = vmatmul.mubr.bf16.vlgmr.msra.gmra.mrb[60].mxu1 %v2233_v6 }
 0x413   : > { %v4187_v7 = vpop.f32.mrb[24].mxu0 }
 0x414   : > { %v4188_v9 = vpop.f32.mrb[25].mxu0 }
 0x415   : > { %v4189_v10 = vadd.f32 %v4188_v9, %v4187_v7  ;;  %v4190_v11 = vpop.f32.mrb[26].mxu0  ;;  %v4209_v12 = vpop.f32.mrb[48].mxu1 }
 0x416   : > { %v4191_v13 = vpop.f32.mrb[27].mxu0  ;;  %v4210_v14 = vpop.f32.mrb[49].mxu1 }
 0x417   : > { %v3297_v15 = vadd.f32 %v4189_v10, %v2493_v8  ;;  %v4211_v16 = vadd.f32 %v4210_v14, %v4209_v12  ;;  %v4212_v17 = vpop.f32.mrb[50].mxu1 }
 0x418   : > { %v4213_v18 = vpop.f32.mrb[51].mxu1 }
 0x419   : > { %v3337_v19 = vadd.f32 %v4211_v16, %v3297_v15 }
 0x433   : > { %v4231_v20 = vpop.f32.mrb[28].mxu0 }
 0x434   : > { %v4232_v21 = vpop.f32.mrb[29].mxu0 }
 0x435   : > { %v4233_v24 = vadd.f32 %v4232_v21, %v4231_v20  ;;  %v4234_v22 = vpop.f32.mrb[30].mxu0  ;;  %v4253_v23 = vpop.f32.mrb[52].mxu1 }
 0x436   : > { %v4235_v26 = vpop.f32.mrb[31].mxu0  ;;  %v4254_v27 = vpop.f32.mrb[53].mxu1 }
 0x437   : > { %v3377_v28 = vadd.f32 %v4233_v24, %v3337_v19  ;;  %v4255_v29 = vadd.f32 %v4254_v27, %v4253_v23  ;;  %v4256_v30 = vpop.f32.mrb[54].mxu1 }
 0x438   : > { %v4257_v31 = vpop.f32.mrb[55].mxu1 }
 0x439   : > { %v3417_v32 = vadd.f32 %v4255_v29, %v3377_v28 }
 0x453   : > { %v4275_v33 = vpop.f32.mrb[32].mxu0 }
 0x454   : > { %v4276_v34 = vpop.f32.mrb[33].mxu0 }
 0x455   : > { %v4277_v35 = vadd.f32 %v4276_v34, %v4275_v33  ;;  %v4278_v36 = vpop.f32.mrb[34].mxu0  ;;  %v4297_v37 = vpop.f32.mrb[56].mxu1 }
 0x456   : > { %v4279_v38 = vpop.f32.mrb[35].mxu0  ;;  %v4298_v39 = vpop.f32.mrb[57].mxu1 }
 0x457   : > { %v3457_v40 = vadd.f32 %v4277_v35, %v3417_v32  ;;  %v4299_v41 = vadd.f32 %v4298_v39, %v4297_v37  ;;  %v4300_v42 = vpop.f32.mrb[58].mxu1 }
 0x458   : > { %v4301_v43 = vpop.f32.mrb[59].mxu1 }
 0x459   : > { %v3497_v44 = vadd.f32 %v4299_v41, %v3457_v40 }
 0x473   : > { %v4319_v45 = vpop.f32.mrb[36].mxu0 }
 0x474   : > { %v4320_v46 = vpop.f32.mrb[37].mxu0 }
 0x475   : > { %v4321_v25 = vadd.f32 %v4320_v46, %v4319_v45  ;;  %v4322_v47 = vpop.f32.mrb[38].mxu0  ;;  %v4341_v48 = vpop.f32.mrb[60].mxu1 }
 0x476   : > { %v4323_v49 = vpop.f32.mrb[39].mxu0  ;;  %v4342_v50 = vpop.f32.mrb[61].mxu1 }
 0x477   : > { %v3537_v51 = vadd.f32 %v4321_v25, %v3497_v44  ;;  %v4343_v52 = vadd.f32 %v4342_v50, %v4341_v48  ;;  %v4344_v53 = vpop.f32.mrb[62].mxu1 }
 0x478   : > { %v4345_v54 = vpop.f32.mrb[63].mxu1 }
 0x479   : > { %v3577_v55 = vadd.f32 %v4343_v52, %v3537_v51 }
 0x47b   : > { %3582 = vst [vmem:[%s297_s19] sm:$0x1] %v3577_v55 }
 0x47c   : > { %4747 = shalt.err (!%p4744_p3)
}
 0x47d   : > { %s4748_s12 = scalar_lea.hbm %s5824_s22, 16  ;;  %s4752_s18 = scalar_lea.hbm %s5874_s8, 32 }
 0x47e   : > { %p4749_p4 = scmp.ne.s32.totalorder %s5824_s22, %s4748_s12  ;;  %p4753_p9 = scmp.lt.u32.totalorder %s5824_s22, %s5874_s8 }
 0x47f   : > { %p4754_p10 = scmp.lt.u32.totalorder %s4752_s18, %s4748_s12  ;;  %p4756_p12 = scmp.lt.u32.totalorder %s4748_s12, %s5824_s22 }
 0x480   : > { %p4750_p7 = pnand %p4749_p4, %p4882_p5 }
 0x481   : > { %p4755_p11 = por %p4754_p10, %p4753_p9 }
 0x482   : > { %p4751_p8 = pneg %p4750_p7 }
 0x483   : > { %p4757_p13 = por %p4756_p12, %p4755_p11 }
 0x485   : > { %p4758_p0 = pnand %p4757_p13, %p4751_p8 }
 0x487   : > { %4761 = shalt.err (!%p4758_p0)
}
 0x488   : > { %4411 = dma.vmem_to_hbm [thread:$0]  (%p4882_p5), %s5826_s20, 16, %s5824_s22, %s3584_s23  }
 0x489 PF: > { %p4417_p1 = scmp.ge.s32.totalorder %s4796_s30, 2  ;;  %s3608_s21 = sand.u32 1, %s4784_s27  }
 0x48a   : > { %s3609_s9 = scalar_lea.sflag [#allocation3], %s3608_s21 }
 0x48b   : > { %p4414_p2 = pnand %p4417_p1, %p4886_p6 }
 0x48d   : > { %4779 = dma.done.wait (!%p4414_p2), %s3609_s9, 16  }
 0x48e   : > { %4781 = vsyncadd (!%p4414_p2), %s3609_s9, 4294967280  ;;  %p18_p3 = scmp.ge.s32.totalorder %s4869_s11, 4   ;;  %s5877_s27 = smov %s4788_s28 }
 0x48f   : > { %s5878_s28 = smov %s4792_s29  ;;  %s5879_s29 = smov %s4880_s14 }
 0x490   : > { %s5880_s30 = smov %s4869_s11  ;;  %20 = sbr.rel (!%p18_p3) target bundleno = 3 (0x3), region = 87 }
 0x497   :  { %3613 = vsyncpa [#allocation3], 1 }
 0x498   :  { %3615 = vsyncpa [#allocation3 + $0x1], 1 }

</bundles_post_ra>
